<compile_context>
chip_gen: v7x
topology: tpu7x:2x2x1
jax: 0.10.0
libtpu: 0.0.40
codegen_flags: <defaults>
</compile_context>

<pallas_src>
import functools
import numpy as np
import jax
import jax.numpy as jnp
from jax.experimental import pallas as pl
from jax.experimental.pallas import tpu as pltpu


_VMEM_LIMIT = 64 * 1024 * 1024
_CONV_BLOCK_BYTES = 8 * 1024 * 1024     # target VMEM footprint of a conv tile
_APPLY_BLOCK_BYTES = 2 * 1024 * 1024    # target VMEM footprint of an apply tile


# --------------------------------------------------------------------------
# small static helpers
# --------------------------------------------------------------------------

def _pick_rows(n, row_bytes, cap_bytes, *, min_rows=1, mult8_or_full=False):
    """Largest divisor of n that fits the byte budget (None if none >= min_rows)."""
    cands = []
    for d in range(1, n + 1):
        if n % d:
            continue
        if d < min_rows:
            continue
        if mult8_or_full and not (d % 8 == 0 or d == n):
            continue
        cands.append(d)
    if not cands:
        return None
    cap_rows = max(1, cap_bytes // max(row_bytes, 1))
    fitting = [d for d in cands if d <= cap_rows]
    return max(fitting) if fitting else min(cands)


# --------------------------------------------------------------------------
# Kernel 1: conv (+bias) fused with per-channel sum / sum-of-squares stats
# --------------------------------------------------------------------------

def _conv_stats_kernel(xa_ref, xb_ref, w_ref, b_ref, y_ref, st_ref, *,
                       k, dilation, th, wo):
    cout = y_ref.shape[-1]
    # Two adjacent H-blocks of the padded input give the halo'd window in VMEM.
    x = jnp.concatenate([xa_ref[0], xb_ref[0]], axis=0)       # (2*bh, Wp, Cin)

    acc = jnp.zeros((th * wo, cout), jnp.float32)
    for i in range(k):                                         # tap rows
        for j in range(k):                                     # tap cols
            r0 = i * dilation
            c0 = j * dilation
            sl = x[r0:r0 + th, c0:c0 + wo, :]                  # (th, wo, cin) bf16
            acc = acc + jnp.dot(sl.reshape(th * wo, sl.shape[-1]),
                                w_ref[i, j],
                                preferred_element_type=jnp.float32)
    acc = acc + b_ref[...]                                     # (1, cout) broadcast

    y_ref[...] = acc.reshape(1, th, wo, cout).astype(y_ref.dtype)

    # Single-pass GroupNorm statistics (sum and sum of squares per channel),
    # accumulated across the row-tile grid axis.
    s1 = jnp.sum(acc, axis=0, keepdims=True)
    s2 = jnp.sum(acc * acc, axis=0, keepdims=True)
    stats = jnp.concatenate([s1, s2], axis=0).reshape(1, 2, cout)

    @pl.when(pl.program_id(1) == 0)
    def _():
        st_ref[...] = jnp.zeros_like(st_ref)

    st_ref[...] += stats


def _conv_direct(x, w, b, *, k, padding, dilation, tile_rows=None):
    """Stride-1 conv.  x: (N,H,W,Cin) bf16, w: (k,k,Cin,Cout), b: (Cout,)."""
    x = x.astype(jnp.bfloat16)
    n, h, wdt, cin = x.shape
    cout = w.shape[-1]
    halo = dilation * (k - 1)
    ho = h + 2 * padding - halo
    wo = wdt + 2 * padding - halo
    wp = wdt + 2 * padding

    row_bytes = 12 * wp * cin + 8 * wo * cout + 2 * wo * cin
    if tile_rows is not None and ho % tile_rows == 0 and tile_rows >= max(halo, 1):
        th = tile_rows
    else:
        th = _pick_rows(ho, row_bytes, _CONV_BLOCK_BYTES, min_rows=max(halo, 1))
        if th is None:          # halo larger than the whole output: single tile
            th = ho
    n_t = ho // th
    bh = th if n_t > 1 else max(th, halo, 1)

    h_total = (n_t + 1) * bh            # extra block so index t+1 always exists
    xp = jnp.pad(x, ((0, 0),
                     (padding, h_total - h - padding),
                     (padding, padding),
                     (0, 0)))
    wr = w.astype(jnp.bfloat16)
    br = b.reshape(1, cout).astype(jnp.float32)

    kern = functools.partial(_conv_stats_kernel, k=k, dilation=dilation,
                             th=th, wo=wo)
    y, stats = pl.pallas_call(
        kern,
        grid=(n, n_t),
        in_specs=[
            pl.BlockSpec((1, bh, wp, cin), lambda s, t: (s, t, 0, 0)),
            pl.BlockSpec((1, bh, wp, cin), lambda s, t: (s, t + 1, 0, 0)),
            pl.BlockSpec((k, k, cin, cout), lambda s, t: (0, 0, 0, 0)),
            pl.BlockSpec((1, cout), lambda s, t: (0, 0)),
        ],
        out_specs=(
            pl.BlockSpec((1, th, wo, cout), lambda s, t: (s, t, 0, 0)),
            pl.BlockSpec((1, 2, cout), lambda s, t: (s, 0, 0)),
        ),
        out_shape=(
            jax.ShapeDtypeStruct((n, ho, wo, cout), jnp.bfloat16),
            jax.ShapeDtypeStruct((n, 2, cout), jnp.float32),
        ),
        compiler_params=pltpu.CompilerParams(
            dimension_semantics=("parallel", "arbitrary"),
            vmem_limit_bytes=_VMEM_LIMIT),
    )(xp, xp, wr, br)
    return y, stats


def _strided_patches(x, k, stride, padding, dilation):
    """Strided-window extraction for stride>1 convs (k*k/s^2 blowup only)."""
    n, h, wdt, c = x.shape
    ho = (h + 2 * padding - dilation * (k - 1) - 1) // stride + 1
    wo = (wdt + 2 * padding - dilation * (k - 1) - 1) // stride + 1
    xp = jnp.pad(x, ((0, 0), (padding, padding), (padding, padding), (0, 0)))
    cols = []
    for i in range(k):
        for j in range(k):
            cols.append(
                xp[:, i * dilation: i * dilation + stride * (ho - 1) + 1: stride,
                      j * dilation: j * dilation + stride * (wo - 1) + 1: stride, :])
    return jnp.concatenate(cols, axis=-1)


def conv2d_stats(x, w, b, *, stride=1, padding=0, dilation=1, tile_rows=None):
    """Conv2d + bias, returning (y bf16, per-channel [sum, sumsq] stats f32)."""
    k = w.shape[0]
    if stride == 1:
        return _conv_direct(x, w, b, k=k, padding=padding, dilation=dilation,
                            tile_rows=tile_rows)
    cin, cout = w.shape[2], w.shape[3]
    patches = _strided_patches(x.astype(jnp.bfloat16), k, stride, padding, dilation)
    w2 = w.reshape(1, 1, k * k * cin, cout)
    return _conv_direct(patches, w2, b, k=1, padding=0, dilation=1,
                        tile_rows=tile_rows)


# --------------------------------------------------------------------------
# GroupNorm scale/shift from fused stats (tiny O(N*C) glue)
# --------------------------------------------------------------------------

def _gn_scale_shift(stats, gamma, beta, groups, spatial, eps=1e-5):
    n, _, c = stats.shape
    cg = c // groups
    s1 = stats[:, 0, :].reshape(n, groups, cg).sum(axis=2)
    s2 = stats[:, 1, :].reshape(n, groups, cg).sum(axis=2)
    cnt = float(spatial * cg)
    mean = s1 / cnt
    var = jnp.maximum(s2 / cnt - mean * mean, 0.0)
    rstd = jax.lax.rsqrt(var + eps)
    mean_c = jnp.repeat(mean, cg, axis=1)
    rstd_c = jnp.repeat(rstd, cg, axis=1)
    scale = rstd_c * gamma[None, :].astype(jnp.float32)
    shift = beta[None, :].astype(jnp.float32) - mean_c * scale
    return scale, shift                              # (N, C) each, f32


# --------------------------------------------------------------------------
# Kernel 2: fused GN-affine (+ residual add) + LeakyReLU, lane-dense layout
# --------------------------------------------------------------------------

def _affine_lrelu_kernel(*refs, n_in, slope):
    o_ref = refs[-1]
    acc = refs[0][...].astype(jnp.float32) * refs[1][...] + refs[2][...]
    for i in range(1, n_in):
        acc = acc + refs[3 * i][...].astype(jnp.float32) * refs[3 * i + 1][...] \
              + refs[3 * i + 2][...]
    o_ref[...] = jnp.where(acc >= 0, acc, slope * acc).astype(o_ref.dtype)


def gn_leaky_apply(ys, scales, shifts, *, slope=0.01, out_dtype=jnp.bfloat16):
    """LeakyReLU(sum_i (y_i * scale_i + shift_i)); inputs NHWC, lane-dense W*C."""
    n, h, wdt, c = ys[0].shape
    wc = wdt * c
    th = _pick_rows(h, wc * (8 * len(ys) + 12), _APPLY_BLOCK_BYTES,
                    mult8_or_full=True)
    if th is None:
        th = h

    args, in_specs = [], []
    for y, sc, sh in zip(ys, scales, shifts):
        args += [y.reshape(n, h, wc),
                 jnp.tile(sc.astype(jnp.float32), (1, wdt)).reshape(n, 1, wc),
                 jnp.tile(sh.astype(jnp.float32), (1, wdt)).reshape(n, 1, wc)]
        in_specs += [pl.BlockSpec((1, th, wc), lambda s, r: (s, r, 0)),
                     pl.BlockSpec((1, 1, wc), lambda s, r: (s, 0, 0)),
                     pl.BlockSpec((1, 1, wc), lambda s, r: (s, 0, 0))]

    kern = functools.partial(_affine_lrelu_kernel, n_in=len(ys), slope=slope)
    out = pl.pallas_call(
        kern,
        grid=(n, h // th),
        in_specs=in_specs,
        out_specs=pl.BlockSpec((1, th, wc), lambda s, r: (s, r, 0)),
        out_shape=jax.ShapeDtypeStruct((n, h, wc), out_dtype),
        compiler_params=pltpu.CompilerParams(
            dimension_semantics=("parallel", "parallel"),
            vmem_limit_bytes=_VMEM_LIMIT),
    )(*args)
    return out.reshape(n, h, wdt, c)


# --------------------------------------------------------------------------
# Module building blocks
# --------------------------------------------------------------------------

def conv_gn(x, p, *, stride=1, padding=0, dilation=1, groups=8, tile_rows=None):
    y, stats = conv2d_stats(x, p['w'], p['b'], stride=stride, padding=padding,
                            dilation=dilation, tile_rows=tile_rows)
    scale, shift = _gn_scale_shift(stats, p['gamma'], p['beta'], groups,
                                   y.shape[1] * y.shape[2])
    return y, scale, shift


def conv_gn_lrelu(x, p, *, stride=1, padding=1, dilation=1,
                  out_dtype=jnp.bfloat16):
    y, scale, shift = conv_gn(x, p, stride=stride, padding=padding,
                              dilation=dilation)
    return gn_leaky_apply([y], [scale], [shift], out_dtype=out_dtype)


def resblock(x, p, *, out_dtype=jnp.bfloat16):
    s = p['stride']
    h1 = conv_gn_lrelu(x, p['conv1'], stride=s, padding=1)
    y2, sc2, sh2 = conv_gn(h1, p['conv2'], stride=1, padding=1)
    if 'down' in p:
        yd, scd, shd = conv_gn(x, p['down'], stride=s, padding=0)
    else:                                   # identity shortcut: scale 1, shift 0
        yd = x
        nb, c = x.shape[0], x.shape[-1]
        scd = jnp.ones((nb, c), jnp.float32)
        shd = jnp.zeros((nb, c), jnp.float32)
    # fused: LeakyReLU(GN(conv2) + GN(down)) in a single elementwise pass
    return gn_leaky_apply([y2, yd], [sc2, scd], [sh2, shd], out_dtype=out_dtype)


def upskip(x, skip, p):
    # TODO(synk): fuse the nearest x2 upsample + concat into the next conv's
    # read path (index_map i//2 gather / input_output_aliases) to avoid this
    # HBM materialization.
    up = jnp.repeat(jnp.repeat(x, 2, axis=1), 2, axis=2)
    up = conv_gn_lrelu(up, p['conv'], stride=1, padding=1)
    return jnp.concatenate([up, skip], axis=-1)


def feature_extractor(x_nchw, p):
    x = jnp.transpose(x_nchw, (0, 2, 3, 1)).astype(jnp.bfloat16)   # NCHW -> NHWC
    map1 = conv_gn_lrelu(x, p['conv'], stride=1, padding=1)
    map2 = resblock(map1, p['block1'])
    map3 = resblock(map2, p['block2'])
    if p['aspp']:
        a1 = conv_gn_lrelu(map3, p['atrous1'], stride=1, padding=3, dilation=3)
        a2 = conv_gn_lrelu(map3, p['atrous2'], stride=1, padding=6, dilation=6)
        a3 = conv_gn_lrelu(map3, p['atrous3'], stride=1, padding=8, dilation=8)
        nb, h3, w3, c3 = map3.shape
        pooled = jnp.mean(map3.astype(jnp.float32), axis=(1, 2))   # AdaptiveAvgPool2d((1,1))
        pooled = pooled.reshape(nb, 1, 1, c3).astype(jnp.bfloat16)
        g = conv_gn_lrelu(pooled, p['gpool'], stride=1, padding=0)
        map3 = (a1.astype(jnp.float32) + a2.astype(jnp.float32)
                + a3.astype(jnp.float32) + g.astype(jnp.float32)).astype(jnp.bfloat16)
    m2 = upskip(map3, map2, p['up1'])
    m2 = resblock(m2, p['block3'])
    m1 = upskip(m2, map1, p['up2'])
    out = resblock(m1, p['block4'], out_dtype=jnp.float32)
    return jnp.transpose(out, (0, 3, 1, 2))                        # NHWC -> NCHW


# --------------------------------------------------------------------------
# Parameter init (deterministic, synthetic); conv weights stored as bf16
# --------------------------------------------------------------------------

def init_conv(key, k, cin, cout):
    kw, kb = jax.random.split(key)
    fan = k * k * cin
    w = (jax.random.normal(kw, (k, k, cin, cout), jnp.float32)
         / np.sqrt(fan)).astype(jnp.bfloat16)
    b = 0.01 * jax.random.normal(kb, (cout,), jnp.float32)
    return {'w': w, 'b': b}


def init_gn(key, c):
    kg, kb = jax.random.split(key)
    return {'gamma': 1.0 + 0.1 * jax.random.normal(kg, (c,), jnp.float32),
            'beta': 0.1 * jax.random.normal(kb, (c,), jnp.float32)}


def init_conv_gn(key, k, cin, cout):
    k1, k2 = jax.random.split(key)
    p = init_conv(k1, k, cin, cout)
    p.update(init_gn(k2, cout))
    return p


def init_resblock(key, cin, cout, stride):
    k1, k2, k3 = jax.random.split(key, 3)
    p = {'stride': stride,
         'conv1': init_conv_gn(k1, 3, cin, cout),
         'conv2': init_conv_gn(k2, 3, cout, cout)}
    if stride != 1 or cin != cout:
        p['down'] = init_conv_gn(k3, 1, cin, cout)
    return p


def init_upskip(key, cin, cout):
    return {'conv': init_conv_gn(key, 3, cin, cout)}


def init_feature_extractor(key, in_channels, base_channels, aspp):
    nc = [base_channels, base_channels * 2, base_channels * 4]
    keys = jax.random.split(key, 12)
    p = {'aspp': aspp,
         'conv': init_conv_gn(keys[0], 3, in_channels, nc[0]),
         'block1': init_resblock(keys[1], nc[0], nc[1], 2),
         'block2': init_resblock(keys[2], nc[1], nc[2], 2),
         'up1': init_upskip(keys[3], nc[2], nc[1]),
         'block3': init_resblock(keys[4], nc[2], nc[1], 1),
         'up2': init_upskip(keys[5], nc[1], nc[0]),
         'block4': init_resblock(keys[6], nc[1], nc[0], 1)}
    if aspp:
        p['atrous1'] = init_conv_gn(keys[7], 3, nc[2], nc[2])
        p['atrous2'] = init_conv_gn(keys[8], 3, nc[2], nc[2])
        p['atrous3'] = init_conv_gn(keys[9], 3, nc[2], nc[2])
        p['gpool'] = init_conv_gn(keys[10], 1, nc[2], nc[2])
    return p


# --------------------------------------------------------------------------

def _conv_ref(x, w, b, stride, padding, dilation):
    out = jax.lax.conv_general_dilated(
        x.astype(jnp.float32), w.astype(jnp.float32),
        window_strides=(stride, stride),
        padding=((padding, padding), (padding, padding)),
        rhs_dilation=(dilation, dilation),
        dimension_numbers=('NHWC', 'HWIO', 'NHWC'))
    return out + b[None, None, None, :].astype(jnp.float32)


if __name__ == "__main__":
    key = jax.random.PRNGKey(0)
    kx, kp, k1, k2, k3, k4, k5, k6 = jax.random.split(key, 8)

    # ---- self-check 1: tiled halo path (forced 4-row tiles -> 4 grid steps) ----
    xc = jax.random.normal(k1, (2, 16, 16, 8), jnp.float32).astype(jnp.bfloat16)
    wc = (jax.random.normal(k2, (3, 3, 8, 16), jnp.float32) / 8.0).astype(jnp.bfloat16)
    bc = 0.01 * jax.random.normal(k3, (16,), jnp.float32)
    y, st = conv2d_stats(xc, wc, bc, stride=1, padding=1, dilation=1, tile_rows=4)
    ref = _conv_ref(xc, wc, bc, 1, 1, 1)
    tol = 2e-2 * (float(jnp.max(jnp.abs(ref))) + 1.0)
    assert float(jnp.max(jnp.abs(y.astype(jnp.float32) - ref))) < tol
    ref_st = jnp.stack([ref.sum(axis=(1, 2)), (ref * ref).sum(axis=(1, 2))], axis=1)
    tol_st = 2e-2 * (float(jnp.max(jnp.abs(ref_st))) + 1.0)
    assert float(jnp.max(jnp.abs(st - ref_st))) < tol_st

    # ---- self-check 2: dilated conv exercising the single-tile halo fallback ----
    xd = jax.random.normal(k4, (2, 4, 4, 16), jnp.float32).astype(jnp.bfloat16)
    wd = (jax.random.normal(k5, (3, 3, 16, 16), jnp.float32) / 12.0).astype(jnp.bfloat16)
    bd = jnp.zeros((16,), jnp.float32)
    yd, _ = conv2d_stats(xd, wd, bd, stride=1, padding=3, dilation=3)
    refd = _conv_ref(xd, wd, bd, 1, 3, 3)
    told = 2e-2 * (float(jnp.max(jnp.abs(refd))) + 1.0)
    assert float(jnp.max(jnp.abs(yd.astype(jnp.float32) - refd))) < told

    # ---- full Feature_extractor forward ----
    in_channels, base_channels, ASPP = 4, 8, True
    x = jax.random.normal(kx, (2, in_channels, 16, 16), jnp.float32)
    params = init_feature_extractor(kp, in_channels, base_channels, ASPP)

    fwd = jax.jit(lambda inp: feature_extractor(inp, params))
    out = fwd(x)
    out = jax.block_until_ready(out)

    assert out.shape == (2, base_channels, 16, 16), out.shape
    assert bool(jnp.all(jnp.isfinite(out)))
    print("KERNEL_OK")
</pallas_src>

<mosaic_0001>
module attributes {stable_mosaic.version = 11 : i64} {
  func.func @_conv_stats_kernel(%arg0: i32, %arg1: i32, %arg2: memref<1x4x18x8xbf16, #tpu.memory_space<vmem>>, %arg3: memref<1x4x18x8xbf16, #tpu.memory_space<vmem>>, %arg4: memref<3x3x8x16xbf16, #tpu.memory_space<vmem>>, %arg5: memref<1x16xf32, #tpu.memory_space<vmem>>, %arg6: memref<1x4x16x16xbf16, #tpu.memory_space<vmem>>, %arg7: memref<1x2x16xf32, #tpu.memory_space<vmem>>) attributes {dimension_semantics = [#tpu.dimension_semantics<parallel>, #tpu.dimension_semantics<arbitrary>], iteration_bounds = array<i64: 2, 4>, scalar_prefetch = 0 : i64, scratch_operands = 0 : i64, tpu.core_type = #tpu.core_type<tc>, window_params = [{transform_indices = @transform_0, window_bounds = array<i64: 1, 4, 18, 8>}, {transform_indices = @transform_1, window_bounds = array<i64: 1, 4, 18, 8>}, {pipeline_mode = #tpu.pipeline_mode<synchronous>, transform_indices = @transform_2, window_bounds = array<i64: 3, 3, 8, 16>}, {pipeline_mode = #tpu.pipeline_mode<synchronous>, transform_indices = @transform_3, window_bounds = array<i64: 1, 16>}, {transform_indices = @transform_4, window_bounds = array<i64: 1, 4, 16, 16>}, {transform_indices = @transform_5, window_bounds = array<i64: 1, 2, 16>}]} {
    %c0 = arith.constant 0 : index
    %c0_0 = arith.constant 0 : index
    %c0_1 = arith.constant 0 : index
    %c0_2 = arith.constant 0 : index
    %0 = vector.load %arg2[%c0, %c0_0, %c0_1, %c0_2] : memref<1x4x18x8xbf16, #tpu.memory_space<vmem>>, vector<1x4x18x8xbf16>
    %1 = vector.shape_cast %0 : vector<1x4x18x8xbf16> to vector<4x18x8xbf16>
    %c0_3 = arith.constant 0 : index
    %c0_4 = arith.constant 0 : index
    %c0_5 = arith.constant 0 : index
    %c0_6 = arith.constant 0 : index
    %2 = vector.load %arg3[%c0_3, %c0_4, %c0_5, %c0_6] : memref<1x4x18x8xbf16, #tpu.memory_space<vmem>>, vector<1x4x18x8xbf16>
    %3 = vector.shape_cast %2 : vector<1x4x18x8xbf16> to vector<4x18x8xbf16>
    %4 = tpu.concatenate %1, %3 in 0 : vector<4x18x8xbf16>, vector<4x18x8xbf16> -> vector<8x18x8xbf16>
    %cst = arith.constant 0.000000e+00 : f32
    %5 = vector.broadcast %cst : f32 to vector<64x16xf32>
    %6 = vector.extract_strided_slice %4 {offsets = [0, 0, 0], sizes = [4, 16, 8], strides = [1, 1, 1]} : vector<8x18x8xbf16> to vector<4x16x8xbf16>
    %7 = vector.shape_cast %6 : vector<4x16x8xbf16> to vector<64x8xbf16>
    %c0_7 = arith.constant 0 : index
    %c0_8 = arith.constant 0 : index
    %c0_9 = arith.constant 0 : index
    %c0_10 = arith.constant 0 : index
    %8 = vector.load %arg4[%c0_7, %c0_8, %c0_9, %c0_10] : memref<3x3x8x16xbf16, #tpu.memory_space<vmem>>, vector<1x1x8x16xbf16>
    %9 = vector.shape_cast %8 : vector<1x1x8x16xbf16> to vector<8x16xbf16>
    %cst_11 = arith.constant dense<0.000000e+00> : vector<64x16xf32>
    %10 = tpu.matmul %7, %9, %cst_11 {dimension_numbers = #tpu.dot_dimension_numbers<[1], [0], [0], [1], [0, 0, 1, 1], [], []>} : vector<64x8xbf16>, vector<8x16xbf16>, vector<64x16xf32> -> vector<64x16xf32>
    %11 = arith.addf %5, %10 : vector<64x16xf32>
    %12 = vector.extract_strided_slice %4 {offsets = [0, 1, 0], sizes = [4, 16, 8], strides = [1, 1, 1]} : vector<8x18x8xbf16> to vector<4x16x8xbf16>
    %13 = vector.shape_cast %12 : vector<4x16x8xbf16> to vector<64x8xbf16>
    %c0_12 = arith.constant 0 : index
    %c1 = arith.constant 1 : index
    %c0_13 = arith.constant 0 : index
    %c0_14 = arith.constant 0 : index
    %14 = vector.load %arg4[%c0_12, %c1, %c0_13, %c0_14] : memref<3x3x8x16xbf16, #tpu.memory_space<vmem>>, vector<1x1x8x16xbf16>
    %15 = vector.shape_cast %14 : vector<1x1x8x16xbf16> to vector<8x16xbf16>
    %cst_15 = arith.constant dense<0.000000e+00> : vector<64x16xf32>
    %16 = tpu.matmul %13, %15, %cst_15 {dimension_numbers = #tpu.dot_dimension_numbers<[1], [0], [0], [1], [0, 0, 1, 1], [], []>} : vector<64x8xbf16>, vector<8x16xbf16>, vector<64x16xf32> -> vector<64x16xf32>
    %17 = arith.addf %11, %16 : vector<64x16xf32>
    %18 = vector.extract_strided_slice %4 {offsets = [0, 2, 0], sizes = [4, 16, 8], strides = [1, 1, 1]} : vector<8x18x8xbf16> to vector<4x16x8xbf16>
    %19 = vector.shape_cast %18 : vector<4x16x8xbf16> to vector<64x8xbf16>
    %c0_16 = arith.constant 0 : index
    %c2 = arith.constant 2 : index
    %c0_17 = arith.constant 0 : index
    %c0_18 = arith.constant 0 : index
    %20 = vector.load %arg4[%c0_16, %c2, %c0_17, %c0_18] : memref<3x3x8x16xbf16, #tpu.memory_space<vmem>>, vector<1x1x8x16xbf16>
    %21 = vector.shape_cast %20 : vector<1x1x8x16xbf16> to vector<8x16xbf16>
    %cst_19 = arith.constant dense<0.000000e+00> : vector<64x16xf32>
    %22 = tpu.matmul %19, %21, %cst_19 {dimension_numbers = #tpu.dot_dimension_numbers<[1], [0], [0], [1], [0, 0, 1, 1], [], []>} : vector<64x8xbf16>, vector<8x16xbf16>, vector<64x16xf32> -> vector<64x16xf32>
    %23 = arith.addf %17, %22 : vector<64x16xf32>
    %24 = vector.extract_strided_slice %4 {offsets = [1, 0, 0], sizes = [4, 16, 8], strides = [1, 1, 1]} : vector<8x18x8xbf16> to vector<4x16x8xbf16>
    %25 = vector.shape_cast %24 : vector<4x16x8xbf16> to vector<64x8xbf16>
    %c1_20 = arith.constant 1 : index
    %c0_21 = arith.constant 0 : index
    %c0_22 = arith.constant 0 : index
    %c0_23 = arith.constant 0 : index
    %26 = vector.load %arg4[%c1_20, %c0_21, %c0_22, %c0_23] : memref<3x3x8x16xbf16, #tpu.memory_space<vmem>>, vector<1x1x8x16xbf16>
    %27 = vector.shape_cast %26 : vector<1x1x8x16xbf16> to vector<8x16xbf16>
    %cst_24 = arith.constant dense<0.000000e+00> : vector<64x16xf32>
    %28 = tpu.matmul %25, %27, %cst_24 {dimension_numbers = #tpu.dot_dimension_numbers<[1], [0], [0], [1], [0, 0, 1, 1], [], []>} : vector<64x8xbf16>, vector<8x16xbf16>, vector<64x16xf32> -> vector<64x16xf32>
    %29 = arith.addf %23, %28 : vector<64x16xf32>
    %30 = vector.extract_strided_slice %4 {offsets = [1, 1, 0], sizes = [4, 16, 8], strides = [1, 1, 1]} : vector<8x18x8xbf16> to vector<4x16x8xbf16>
    %31 = vector.shape_cast %30 : vector<4x16x8xbf16> to vector<64x8xbf16>
    %c1_25 = arith.constant 1 : index
    %c1_26 = arith.constant 1 : index
    %c0_27 = arith.constant 0 : index
    %c0_28 = arith.constant 0 : index
    %32 = vector.load %arg4[%c1_25, %c1_26, %c0_27, %c0_28] : memref<3x3x8x16xbf16, #tpu.memory_space<vmem>>, vector<1x1x8x16xbf16>
    %33 = vector.shape_cast %32 : vector<1x1x8x16xbf16> to vector<8x16xbf16>
    %cst_29 = arith.constant dense<0.000000e+00> : vector<64x16xf32>
    %34 = tpu.matmul %31, %33, %cst_29 {dimension_numbers = #tpu.dot_dimension_numbers<[1], [0], [0], [1], [0, 0, 1, 1], [], []>} : vector<64x8xbf16>, vector<8x16xbf16>, vector<64x16xf32> -> vector<64x16xf32>
    %35 = arith.addf %29, %34 : vector<64x16xf32>
    %36 = vector.extract_strided_slice %4 {offsets = [1, 2, 0], sizes = [4, 16, 8], strides = [1, 1, 1]} : vector<8x18x8xbf16> to vector<4x16x8xbf16>
    %37 = vector.shape_cast %36 : vector<4x16x8xbf16> to vector<64x8xbf16>
    %c1_30 = arith.constant 1 : index
    %c2_31 = arith.constant 2 : index
    %c0_32 = arith.constant 0 : index
    %c0_33 = arith.constant 0 : index
    %38 = vector.load %arg4[%c1_30, %c2_31, %c0_32, %c0_33] : memref<3x3x8x16xbf16, #tpu.memory_space<vmem>>, vector<1x1x8x16xbf16>
    %39 = vector.shape_cast %38 : vector<1x1x8x16xbf16> to vector<8x16xbf16>
    %cst_34 = arith.constant dense<0.000000e+00> : vector<64x16xf32>
    %40 = tpu.matmul %37, %39, %cst_34 {dimension_numbers = #tpu.dot_dimension_numbers<[1], [0], [0], [1], [0, 0, 1, 1], [], []>} : vector<64x8xbf16>, vector<8x16xbf16>, vector<64x16xf32> -> vector<64x16xf32>
    %41 = arith.addf %35, %40 : vector<64x16xf32>
    %42 = vector.extract_strided_slice %4 {offsets = [2, 0, 0], sizes = [4, 16, 8], strides = [1, 1, 1]} : vector<8x18x8xbf16> to vector<4x16x8xbf16>
    %43 = vector.shape_cast %42 : vector<4x16x8xbf16> to vector<64x8xbf16>
    %c2_35 = arith.constant 2 : index
    %c0_36 = arith.constant 0 : index
    %c0_37 = arith.constant 0 : index
    %c0_38 = arith.constant 0 : index
    %44 = vector.load %arg4[%c2_35, %c0_36, %c0_37, %c0_38] : memref<3x3x8x16xbf16, #tpu.memory_space<vmem>>, vector<1x1x8x16xbf16>
    %45 = vector.shape_cast %44 : vector<1x1x8x16xbf16> to vector<8x16xbf16>
    %cst_39 = arith.constant dense<0.000000e+00> : vector<64x16xf32>
    %46 = tpu.matmul %43, %45, %cst_39 {dimension_numbers = #tpu.dot_dimension_numbers<[1], [0], [0], [1], [0, 0, 1, 1], [], []>} : vector<64x8xbf16>, vector<8x16xbf16>, vector<64x16xf32> -> vector<64x16xf32>
    %47 = arith.addf %41, %46 : vector<64x16xf32>
    %48 = vector.extract_strided_slice %4 {offsets = [2, 1, 0], sizes = [4, 16, 8], strides = [1, 1, 1]} : vector<8x18x8xbf16> to vector<4x16x8xbf16>
    %49 = vector.shape_cast %48 : vector<4x16x8xbf16> to vector<64x8xbf16>
    %c2_40 = arith.constant 2 : index
    %c1_41 = arith.constant 1 : index
    %c0_42 = arith.constant 0 : index
    %c0_43 = arith.constant 0 : index
    %50 = vector.load %arg4[%c2_40, %c1_41, %c0_42, %c0_43] : memref<3x3x8x16xbf16, #tpu.memory_space<vmem>>, vector<1x1x8x16xbf16>
    %51 = vector.shape_cast %50 : vector<1x1x8x16xbf16> to vector<8x16xbf16>
    %cst_44 = arith.constant dense<0.000000e+00> : vector<64x16xf32>
    %52 = tpu.matmul %49, %51, %cst_44 {dimension_numbers = #tpu.dot_dimension_numbers<[1], [0], [0], [1], [0, 0, 1, 1], [], []>} : vector<64x8xbf16>, vector<8x16xbf16>, vector<64x16xf32> -> vector<64x16xf32>
    %53 = arith.addf %47, %52 : vector<64x16xf32>
    %54 = vector.extract_strided_slice %4 {offsets = [2, 2, 0], sizes = [4, 16, 8], strides = [1, 1, 1]} : vector<8x18x8xbf16> to vector<4x16x8xbf16>
    %55 = vector.shape_cast %54 : vector<4x16x8xbf16> to vector<64x8xbf16>
    %c2_45 = arith.constant 2 : index
    %c2_46 = arith.constant 2 : index
    %c0_47 = arith.constant 0 : index
    %c0_48 = arith.constant 0 : index
    %56 = vector.load %arg4[%c2_45, %c2_46, %c0_47, %c0_48] : memref<3x3x8x16xbf16, #tpu.memory_space<vmem>>, vector<1x1x8x16xbf16>
    %57 = vector.shape_cast %56 : vector<1x1x8x16xbf16> to vector<8x16xbf16>
    %cst_49 = arith.constant dense<0.000000e+00> : vector<64x16xf32>
    %58 = tpu.matmul %55, %57, %cst_49 {dimension_numbers = #tpu.dot_dimension_numbers<[1], [0], [0], [1], [0, 0, 1, 1], [], []>} : vector<64x8xbf16>, vector<8x16xbf16>, vector<64x16xf32> -> vector<64x16xf32>
    %59 = arith.addf %53, %58 : vector<64x16xf32>
    %c0_50 = arith.constant 0 : index
    %c0_51 = arith.constant 0 : index
    %60 = vector.load %arg5[%c0_50, %c0_51] : memref<1x16xf32, #tpu.memory_space<vmem>>, vector<1x16xf32>
    %61 = vector.broadcast %60 : vector<1x16xf32> to vector<64x16xf32>
    %62 = arith.addf %59, %61 : vector<64x16xf32>
    %63 = vector.shape_cast %62 : vector<64x16xf32> to vector<1x4x16x16xf32>
    %64 = arith.truncf %63 : vector<1x4x16x16xf32> to vector<1x4x16x16xbf16>
    %c0_52 = arith.constant 0 : index
    %c0_53 = arith.constant 0 : index
    %c0_54 = arith.constant 0 : index
    %c0_55 = arith.constant 0 : index
    %65 = vector.load %arg6[%c0_52, %c0_53, %c0_54, %c0_55] : memref<1x4x16x16xbf16, #tpu.memory_space<vmem>>, vector<1x4x16x16xbf16>
    tpu.vector_store %arg6[%c0_52, %c0_53, %c0_54, %c0_55], %64 {strides = array<i32>} : memref<1x4x16x16xbf16, #tpu.memory_space<vmem>>, vector<1x4x16x16xbf16>,
    %cst_56 = arith.constant dense<0.000000e+00> : vector<16xf32>
    %66 = vector.multi_reduction <add>, %62, %cst_56 [0] : vector<64x16xf32> to vector<16xf32>
    %67 = vector.shape_cast %66 : vector<16xf32> to vector<1x16xf32>
    %68 = arith.mulf %62, %62 : vector<64x16xf32>
    %cst_57 = arith.constant dense<0.000000e+00> : vector<16xf32>
    %69 = vector.multi_reduction <add>, %68, %cst_57 [0] : vector<64x16xf32> to vector<16xf32>
    %70 = vector.shape_cast %69 : vector<16xf32> to vector<1x16xf32>
    %71 = tpu.concatenate %67, %70 in 0 : vector<1x16xf32>, vector<1x16xf32> -> vector<2x16xf32>
    %72 = vector.shape_cast %71 : vector<2x16xf32> to vector<1x2x16xf32>
    %c0_i32 = arith.constant 0 : i32
    %73 = arith.cmpi eq, %arg1, %c0_i32 : i32
    %74 = arith.extui %73 : i1 to i32
    %c0_i32_58 = arith.constant 0 : i32
    %75 = arith.cmpi ne, %74, %c0_i32_58 : i32
    scf.if %75 {
      %cst_65 = arith.constant 0.000000e+00 : f32
      %79 = vector.broadcast %cst_65 : f32 to vector<1x2x16xf32>
      %c0_66 = arith.constant 0 : index
      %c0_67 = arith.constant 0 : index
      %c0_68 = arith.constant 0 : index
      %80 = vector.load %arg7[%c0_66, %c0_67, %c0_68] : memref<1x2x16xf32, #tpu.memory_space<vmem>>, vector<1x2x16xf32>
      tpu.vector_store %arg7[%c0_66, %c0_67, %c0_68], %79 {strides = array<i32>} : memref<1x2x16xf32, #tpu.memory_space<vmem>>, vector<1x2x16xf32>,
    } else {
    }
    %c0_59 = arith.constant 0 : index
    %c0_60 = arith.constant 0 : index
    %c0_61 = arith.constant 0 : index
    %76 = vector.load %arg7[%c0_59, %c0_60, %c0_61] : memref<1x2x16xf32, #tpu.memory_space<vmem>>, vector<1x2x16xf32>
    %77 = arith.addf %76, %72 : vector<1x2x16xf32>
    %c0_62 = arith.constant 0 : index
    %c0_63 = arith.constant 0 : index
    %c0_64 = arith.constant 0 : index
    %78 = vector.load %arg7[%c0_62, %c0_63, %c0_64] : memref<1x2x16xf32, #tpu.memory_space<vmem>>, vector<1x2x16xf32>
    tpu.vector_store %arg7[%c0_62, %c0_63, %c0_64], %77 {strides = array<i32>} : memref<1x2x16xf32, #tpu.memory_space<vmem>>, vector<1x2x16xf32>,
    return
  }
  func.func @transform_0(%arg0: i32, %arg1: i32) -> (i32, i32, i32, i32) {
    %c0_i32 = arith.constant 0 : i32
    %c0_i32_0 = arith.constant 0 : i32
    %c0_i32_1 = arith.constant 0 : i32
    return %arg0, %arg1, %c0_i32, %c0_i32_0 : i32, i32, i32, i32
  }
  func.func @transform_1(%arg0: i32, %arg1: i32) -> (i32, i32, i32, i32) {
    %c1_i32 = arith.constant 1 : i32
    %0 = arith.addi %arg1, %c1_i32 : i32
    %c0_i32 = arith.constant 0 : i32
    %c0_i32_0 = arith.constant 0 : i32
    %c0_i32_1 = arith.constant 0 : i32
    return %arg0, %0, %c0_i32, %c0_i32_0 : i32, i32, i32, i32
  }
  func.func @transform_2(%arg0: i32, %arg1: i32) -> (i32, i32, i32, i32) {
    %c0_i32 = arith.constant 0 : i32
    %c0_i32_0 = arith.constant 0 : i32
    %c0_i32_1 = arith.constant 0 : i32
    %c0_i32_2 = arith.constant 0 : i32
    %c0_i32_3 = arith.constant 0 : i32
    return %c0_i32, %c0_i32_0, %c0_i32_1, %c0_i32_2 : i32, i32, i32, i32
  }
  func.func @transform_3(%arg0: i32, %arg1: i32) -> (i32, i32) {
    %c0_i32 = arith.constant 0 : i32
    %c0_i32_0 = arith.constant 0 : i32
    %c0_i32_1 = arith.constant 0 : i32
    return %c0_i32, %c0_i32_0 : i32, i32
  }
  func.func @transform_4(%arg0: i32, %arg1: i32) -> (i32, i32, i32, i32) {
    %c0_i32 = arith.constant 0 : i32
    %c0_i32_0 = arith.constant 0 : i32
    %c0_i32_1 = arith.constant 0 : i32
    return %arg0, %arg1, %c0_i32, %c0_i32_0 : i32, i32, i32, i32
  }
  func.func @transform_5(%arg0: i32, %arg1: i32) -> (i32, i32, i32) {
    %c0_i32 = arith.constant 0 : i32
    %c0_i32_0 = arith.constant 0 : i32
    %c0_i32_1 = arith.constant 0 : i32
    return %arg0, %c0_i32, %c0_i32_0 : i32, i32, i32
  }
}

</mosaic_0001>

<bundles_post_ra>
// kernel: tpu_custom_call.1
= control target key start
LH: loop header
LB: loop body
LE: loop exit
PB: predicated region body
PF: predicated region fallthrough
CT: control target
= control target key end

     0   :  { %s3311_s0 = inlined_call_operand.hbm [shape: bf16[2,20,18,8], index: 0, kind: input, shape index: {}]   ;;  %s3312_s1 = inlined_call_operand.hbm [shape: bf16[2,20,18,8], index: 1, kind: input, shape index: {}]   ;;  %s3313_s2 = inlined_call_operand.hbm [shape: bf16[3,3,8,16], index: 2, kind: input, shape index: {}]   ;;  %s3314_s3 = inlined_call_operand.hbm [shape: f32[1,16], index: 3, kind: input, shape index: {}]   ;;  %s3315_s4 = inlined_call_operand.hbm [shape: bf16[2,16,16,16], index: 4, kind: output, shape index: {0}]   ;;  %s3316_s5 = inlined_call_operand.hbm [shape: f32[2,2,16], index: 5, kind: output, shape index: {1}]  }
   0x1   :  { %3346 = sst [smem:[#allocation32_spill]] %s3311_s0 }
   0x2   :  { %3347 = sst [smem:[#allocation33_spill]] %s3312_s1 }
   0x3   :  { %3348 = sst [smem:[#allocation34_spill]] %s3313_s2 }
   0x4   :  { %3349 = sst [smem:[#allocation35_spill]] %s3314_s3 }
   0x5   :  { %3350 = sst [smem:[#allocation36_spill]] %s3315_s4 }
   0x6   :  { %3351 = sst [smem:[#allocation37_spill]] %s3316_s5 }
   0x7   :  { %11 = vsyncpa [#allocation3], 0 }
   0x8   :  { %13 = vsyncpa [#allocation3 + $0x1], 0 }
   0x9   :  { %14 = vsyncpa [#allocation6], 0 }
   0xa   :  { %16 = vsyncpa [#allocation6 + $0x1], 0 }
   0xb   :  { %17 = vsyncpa [#allocation9], 0 }
   0xc   :  { %18 = vsyncpa [#allocation4], 0 }
   0xd   :  { %20 = vsyncpa [#allocation4 + $0x1], 0 }
   0xe   :  { %21 = vsyncpa [#allocation12], 0 }
   0xf   :  { %23 = vsyncpa [#allocation12 + $0x1], 0  ;;  %s2536_s18 = smov 0   ;;  %s2538_s19 = smov 0  }
  0x10   :  { %s2540_s20 = smov 0   ;;  %s2542_s21 = smov 0  }
  0x11   :  { %s2544_s22 = smov 0   ;;  %s2546_s23 = smov 0  }
  0x12   :  { %s2548_s24 = smov 0   ;;  %s2550_s25 = smov 0  }
  0x13   :  { %s2552_s26 = smov 0   ;;  %s2554_s27 = smov 0  }
  0x14   :  { %s2556_s28 = smov 0   ;;  %s2558_s29 = smov 0  }
  0x15   :  { %s2560_s30 = smov 0   ;;  %s2562_s6 = smov 0  }
  0x16 LB: > { %3352 = sst [smem:[#allocation19_spill]] %s2441_s18  ;;  %s2605_s7 = sadd.s32 4294967295, %s2493_s6   ;;  %s2493_s6 = sphi %s2562_s6, %s29_s6   ;;  %s2489_s30 = sphi %s2560_s30, %s3418_s30   ;;  %s2485_s29 = sphi %s2558_s29, %s3417_s29   ;;  %s2481_s28 = sphi %s2556_s28, %s3416_s28   ;;  %s2477_s27 = sphi %s2554_s27, %s3415_s27   ;;  %s2473_s26 = sphi %s2552_s26, %s3427_s26   ;;  %s2469_s25 = sphi %s2550_s25, %s3426_s25   ;;  %s2465_s24 = sphi %s2548_s24, %s3425_s24   ;;  %s2461_s23 = sphi %s2546_s23, %s3424_s23   ;;  %s2457_s22 = sphi %s2544_s22, %s3423_s22   ;;  %s2453_s21 = sphi %s2542_s21, %s3422_s21   ;;  %s2449_s20 = sphi %s2540_s20, %s3421_s20   ;;  %s2445_s19 = sphi %s2538_s19, %s3420_s19   ;;  %s2441_s18 = sphi %s2536_s18, %s3419_s18  }
  0x17   : > { %3353 = sst [smem:[#allocation20_spill]] %s2465_s24  ;;  %s1699_s8 = sadd.s32 4294967294, %s2493_s6  }
  0x18   : > { %3354 = sst [smem:[#allocation21_spill]] %s2477_s27  ;;  %p63_p0 = scmp.ne.s32.totalorder %s2469_s25, %s2465_s24 }
  0x19   : > { %3355 = sst [smem:[#allocation22_spill]] %s2481_s28  ;;  %p3324_p1 = scmp.eq.s32.totalorder %s2605_s7, 0 }
  0x1a   : > { %3356 = sst [smem:[#allocation23_spill]] %s2485_s29  ;;  %p93_p2 = scmp.ne.s32.totalorder %s2457_s22, %s2453_s21 }
  0x1b   : > { %3357 = sst [smem:[#allocation24_spill]] %s2489_s30  ;;  %p3325_p3 = scmp.eq.s32.totalorder %s2605_s7, 7 }
  0x1c   : > { %p2615_p4 = por %p3324_p1, %p63_p0  ;;  %p167_p5 = scmp.eq.s32.totalorder %s1699_s8, 7 }
  0x1d   : > { %p2621_p6 = por %p93_p2, %p3324_p1  ;;  %p186_p8 = scmp.ne.s32.totalorder %s2449_s20, %s2445_s19 }
  0x1e   : > { %s3358_s9 = scalar_select %p2615_p4, 1, 0 }
  0x1f   : > { %s3359_s10 = scalar_select %p2621_p6, 1, 0 }
  0x20   : > { %p2625_p7 = por %p167_p5, %p63_p0  ;;  %p192_p9 = scmp.ne.s32.totalorder %s2445_s19, %s2441_s18 }
  0x21   : > { %p1700_p10 = scmp.ge.s32.totalorder %s2493_s6, 1  ;;  %p2636_p11 = por %p186_p8, %p3325_p3 }
  0x22   : > { %s3360_s11 = scalar_select %p2625_p7, 1, 0 }
  0x23   : > { %s3362_s12 = scalar_select %p2636_p11, 1, 0 }
  0x24   : > { %3361 = sst [smem:[#allocation25_spill]] %s3360_s11  ;;  %p200_p12 = scmp.lt.s32.totalorder %s2493_s6, 9 }
  0x25   : > { %3363 = sst [smem:[#allocation26_spill]] %s3362_s12  ;;  %p2641_p13 = por %p192_p9, %p167_p5 }
  0x26   : > { %p2645_p2 = pnand %p1700_p10, %p200_p12  ;;  %s2495_s15 = smov [#allocation7]  }
  0x27   : > { %s3364_s13 = scalar_select %p2641_p13, 1, 0 }
  0x28   : > { %s3366_s14 = scalar_select %p2645_p2, 1, 0 }
  0x29   : > { %3365 = sst [smem:[#allocation27_spill]] %s3364_s13  ;;  %s212_s16 = sshll.u32 %s2495_s15, 4  ;;  %s213_s16 = int_to_ptr.vmem [resolvable:$true] %s212_s16 }
  0x2a   : > { %p2034_p0 = pneg %p2645_p2  ;;  %s2496_s21 = smov [#allocation8]  }
  0x2b   : > { %s226_s8 = sshll.u32 %s2496_s21, 4  ;;  %s3368_s2 = sld [smem:[#allocation34_spill]]  ;;  %s2657_s8 = int_to_ptr.vmem [resolvable:$true] %s226_s8 }
  0x2c   : > { %p2653_p8 = pnand %p2034_p0, %p3324_p1 }
  0x2e   : > { %p2188_p9 = pneg %p2653_p8 }
  0x31   : > { %s2186_s11 = scalar_lea.hbm %s3368_s2, 576 }
  0x32   : > { %p2187_p5 = scmp.ne.s32.totalorder %s3368_s2, %s2186_s11  ;;  %p2193_p0 = scmp.lt.u32.totalorder %s2186_s11, %s3368_s2 }
  0x34   : > { %p2189_p10 = pnand %p2188_p9, %p2187_p5 }
  0x36   : > { %p2190_p12 = pneg %p2189_p10 }
  0x38   : > { %p2195_p1 = pnand %p2193_p0, %p2190_p12 }
  0x3a   : > { %2198 = shalt.err (!%p2195_p1)
}
  0x3b   : > { %s2199_s21 = scalar_lea.vmem %s213_s16, 576  ;;  %p2207_p11 = scmp.lt.s32.totalorder %s213_s16, %s213_s16 }
  0x3c   : > { %p2200_p3 = scmp.ne.s32.totalorder %s213_s16, %s2199_s21  ;;  %p2208_p6 = scmp.lt.s32.totalorder %s2199_s21, %s2199_s21 }
  0x3e   : > { %p2202_p13 = pnand %p2200_p3, %p2188_p9  ;;  %p2209_p4 = por %p2208_p6, %p2207_p11 }
  0x40   : > { %p2203_p7 = pneg %p2202_p13 }
  0x42   : > { %p2210_p2 = pnand %p2209_p4, %p2203_p7 }
  0x44   : > { %2213 = shalt.err (!%p2210_p2)
}
  0x45   : > { %s3332_s18 = smov 64   ;;  %s3334_s24 = smov 4  }
  0x46   : > { %2037 = dma.hbm_to_vmem [thread:$0]  (!%p2653_p8), %s3368_s2, 576, %s213_s16, [#allocation6], %s3332_s18, %s3332_s18, %s3334_s24  }
  0x47   : > { %s3369_s3 = sld [smem:[#allocation35_spill]] }
  0x4d   : > { %s2214_s15 = scalar_lea.hbm %s3369_s3, 16 }
  0x4e   : > { %p2215_p1 = scmp.ne.s32.totalorder %s3369_s3, %s2214_s15  ;;  %p2221_p6 = scmp.lt.u32.totalorder %s2214_s15, %s3369_s3 }
  0x50   : > { %p2217_p3 = pnand %p2215_p1, %p2188_p9 }
  0x52   : > { %p2218_p4 = pneg %p2217_p3 }
  0x54   : > { %p2223_p7 = pnand %p2221_p6, %p2218_p4 }
  0x56   : > { %2226 = shalt.err (!%p2223_p7)
}
  0x57   : > { %s2227_s16 = scalar_lea.vmem %s2657_s8, 16  ;;  %s2234_s4 = scalar_lea.vmem %s2657_s8, 32 }
  0x58   : > { %p2228_p11 = scmp.ne.s32.totalorder %s2657_s8, %s2227_s16  ;;  %p2235_p5 = scmp.lt.s32.totalorder %s2657_s8, %s2657_s8 }
  0x59   : > { %p2236_p10 = scmp.lt.s32.totalorder %s2234_s4, %s2227_s16 }
  0x5a   : > { %p2230_p13 = pnand %p2228_p11, %p2188_p9 }
  0x5b   : > { %p2237_p12 = por %p2236_p10, %p2235_p5 }
  0x5c   : > { %p2231_p2 = pneg %p2230_p13 }
  0x5e   : > { %p2238_p0 = pnand %p2237_p12, %p2231_p2 }
  0x60   : > { %2241 = shalt.err (!%p2238_p0)
}
  0x61   : > { %2040 = dma.hbm_to_vmem [thread:$0]  (!%p2653_p8), %s3369_s3, 16, %s2657_s8, [#allocation9]  }
  0x62   : > { %s38_s5 = sadd.s32 1, %s2485_s29  ;;  %s41_s17 = sadd.s32 1, %s2489_s30 }
  0x63   : > { %p39_p9 = scmp.ge.s32.totalorder %s38_s5, 4  ;;  %s176_s11 = sadd.s32 1, %s2449_s20 }
  0x64   : > { %p57_p1 = scmp.ne.s32.totalorder %s2473_s26, %s2469_s25  ;;  %s50_s13 = sadd.s32 1, %s2473_s26 }
  0x65   : > { %s2715_s12 = scalar_select %p39_p9, 0, %s38_s5  }
  0x66   : > { %s3429_s17 = smov (!%p39_p9, %s41_s17), %s2489_s30  ;;  %p3341_p3 = scmp.eq.s32.totalorder %s2493_s6, 0 }
  0x67   : > { %3370 = sst [smem:[#allocation28_spill]] %s2715_s12  ;;  %p43_p4 = scmp.ge.s32.totalorder %s3429_s17, 2 }
  0x68   : > { %s74_s8 = sadd.s32 1, %s2715_s12  ;;  %s46_s15 = ssub.s32 %s2485_s29, %s2715_s12 }
  0x69   : > { %p2725_p8 = por %p3341_p3, %p57_p1  ;;  %s3431_s17 = smov (%p43_p4, %s3429_s17), 0 }
  0x6a   : > { %3372 = sst [smem:[#allocation29_spill]] %s3431_s17  ;;  %s76_s16 = ssub.s32 %s38_s5, %s74_s8 }
  0x6b   : > { %p3373_p6 = scmp.eq.s32.totalorder %s2605_s7, 7  ;;  %s45_s27 = ssub.s32 %s2489_s30, %s3431_s17 }
  0x6c   : > { %p3340_p11 = scmp.lt.s32.totalorder %s2493_s6, 8  ;;  %s47_s28 = sor.u32 %s46_s15, %s45_s27 }
  0x6d   : > { %p2733_p7 = por %p3373_p6, %p57_p1  ;;  %s237_s18 = sand.u32 1, %s2473_s26  }
  0x6e   : > { %p48_p13 = scmp.eq.s32.totalorder %s47_s28, 0  ;;  %s77_s24 = sor.u32 %s76_s16, %s45_s27 }
  0x6f   : > { %s3374_s4 = scalar_select %p2733_p7, 1, 0 }
  0x70   : > { %p174_p2 = scmp.eq.s32.totalorder %s45_s27, 0  ;;  %s2012_s12 = smul.u32 48, %s237_s18 }
  0x71   : > { %3375 = sst [smem:[#allocation30_spill]] %s3374_s4  ;;  %p2751_p5 = pnand %p3340_p11, %p2725_p8 }
  0x72   : > { %s2742_s2 = scalar_select %p48_p13, %s2473_s26, %s50_s13  }
  0x73   : > { %s2745_s3 = scalar_select %p174_p2, %s2449_s20, %s176_s11  }
  0x74   : > { %3376 = sst [smem:[#allocation31_spill]] %s2742_s2  ;;  %s2013_s8 = smul.u32 12, %s2485_s29 }
  0x75   : > { %s2014_s17 = smul.u32 60, %s2489_s30  ;;  %s241_s15 = scalar_lea.vmem [#allocation2], %s2012_s12 }
  0x76   : > { %s251_s4 = sshll.u32 %s241_s15, 4  ;;  %p2761_p10 = scmp.eq.s32.totalorder %s77_s24, 0  ;;  %s2759_s4 = int_to_ptr.vmem [resolvable:$true] %s251_s4 }
  0x77   : > { %s2757_s28 = sadd.s32 %s2014_s17, %s2013_s8  ;;  %s3379_s0 = sld [smem:[#allocation32_spill]] }
  0x78   : > { %s1706_s13 = sshll.u32 %s2757_s28, 6  ;;  %s2773_s17 = scalar_lea.sflag [#allocation3], %s237_s18 }
  0x79   : > { %p2244_p0 = pneg %p2751_p5 }
  0x7d   : > { %s2771_s27 = scalar_lea.hbm %s3379_s0, %s1706_s13  ;;  %s2247_s15 = scalar_lea.hbm %s3379_s0, 7680 }
  0x7e   : > { %s2242_s12 = scalar_lea.hbm %s2771_s27, 768  ;;  %p2248_p4 = scmp.lt.u32.totalorder %s2771_s27, %s3379_s0 }
  0x7f   : > { %p2243_p12 = scmp.ne.s32.totalorder %s2771_s27, %s2242_s12  ;;  %p2249_p8 = scmp.lt.u32.totalorder %s2247_s15, %s2242_s12 }
  0x80   : > { %p2251_p13 = scmp.lt.u32.totalorder %s2242_s12, %s2771_s27 }
  0x81   : > { %p2245_p9 = pnand %p2244_p0, %p2243_p12  ;;  %p2250_p6 = por %p2249_p8, %p2248_p4 }
  0x83   : > { %p2246_p1 = pneg %p2245_p9  ;;  %p2252_p2 = por %p2251_p13, %p2250_p6 }
  0x85   : > { %p2253_p11 = pnand %p2252_p2, %p2246_p1 }
  0x87   : > { %2256 = shalt.err (!%p2253_p11)
}
  0x88   : > { %s2257_s18 = scalar_lea.vmem %s2759_s4, 768  ;;  %s2499_s24 = smov [#allocation2]  }
  0x89   : > { %p2258_p12 = scmp.ne.s32.totalorder %s2759_s4, %s2257_s18  ;;  %s2262_s8 = sshll.u32 %s2499_s24, 4  ;;  %s2263_s8 = int_to_ptr.vmem [resolvable:$false] %s2262_s8 }
  0x8a   : > { %s2264_s21 = scalar_lea.vmem %s2263_s8, 1536  ;;  %p2265_p7 = scmp.lt.s32.totalorder %s2759_s4, %s2263_s8 }
  0x8b   : > { %p2260_p9 = pnand %p2258_p12, %p2244_p0  ;;  %p2266_p4 = scmp.lt.s32.totalorder %s2264_s21, %s2257_s18 }
  0x8d   : > { %p2261_p3 = pneg %p2260_p9  ;;  %p2267_p8 = por %p2266_p4, %p2265_p7 }
  0x8f   : > { %p2268_p6 = pnand %p2267_p8, %p2261_p3 }
  0x91   : > { %2271 = shalt.err (!%p2268_p6)
}
  0x92   : > { %s3380_s12 = smov 4   ;;  %s3381_s15 = smov 64  }
  0x93   : > { %2044 = dma.hbm_to_vmem [thread:$0]  (!%p2751_p5), %s2771_s27, 768, %s2759_s4, %s2773_s17, %s3381_s15, %s3381_s15, %s3380_s12  }
  0x94   : > { %s3382_s1 = sld [smem:[#allocation33_spill]]  ;;  %s80_s24 = sadd.s32 1, %s2461_s23 }
  0x95   : > { %s2813_s8 = scalar_select %p2761_p10, %s2461_s23, %s80_s24  }
  0x96   : > { %p87_p3 = scmp.ne.s32.totalorder %s2461_s23, %s2457_s22  ;;  %s261_s21 = sand.u32 1, %s2493_s6  }
  0x97   : > { %s263_s0 = sand.u32 1, %s2461_s23   ;;  %p3383_p7 = scmp.eq.s32.totalorder %s2493_s6, 0 }
  0x98   : > { %s2015_s30 = smul.u32 48, %s263_s0  ;;  %p3384_p0 = scmp.lt.s32.totalorder %s2493_s6, 8 }
  0x99   : > { %p89_p11 = por %p87_p3, %p3383_p7 }
  0x9a   : > { %s1588_s18 = scalar_lea.hbm %s3382_s1, %s1706_s13  ;;  %s265_s28 = scalar_lea.vmem [#allocation5], %s2015_s30 }
  0x9b   : > { %s2821_s29 = scalar_lea.hbm %s1588_s18, 768  ;;  %p2825_p5 = pnand %p3384_p0, %p89_p11 }
  0x9c   : > { %s276_s11 = sshll.u32 %s265_s28, 4  ;;  %s2831_s13 = scalar_lea.sflag [#allocation6], %s261_s21  ;;  %s2829_s11 = int_to_ptr.vmem [resolvable:$true] %s276_s11 }
  0x9d   : > { %s2302_s27 = scalar_lea.hbm %s1588_s18, 1536  ;;  %p2274_p1 = pneg %p2825_p5 }
  0x9e   : > { %p2273_p10 = scmp.ne.s32.totalorder %s2821_s29, %s2302_s27  ;;  %s2277_s16 = scalar_lea.hbm %s3382_s1, 7680 }
  0x9f   : > { %p2278_p12 = scmp.lt.u32.totalorder %s2821_s29, %s3382_s1  ;;  %p2279_p9 = scmp.lt.u32.totalorder %s2277_s16, %s2302_s27 }
  0xa0   : > { %p2275_p13 = pnand %p2274_p1, %p2273_p10  ;;  %p2281_p8 = scmp.lt.u32.totalorder %s2302_s27, %s2821_s29 }
  0xa1   : > { %p2280_p4 = por %p2279_p9, %p2278_p12 }
  0xa2   : > { %p2276_p2 = pneg %p2275_p13 }
  0xa3   : > { %p2282_p6 = por %p2281_p8, %p2280_p4 }
  0xa5   : > { %p2283_p3 = pnand %p2282_p6, %p2276_p2 }
  0xa7   : > { %2286 = shalt.err (!%p2283_p3)
}
  0xa8   : > { %s2287_s30 = scalar_lea.vmem %s2829_s11, 768  ;;  %s2500_s18 = smov [#allocation5]  }
  0xa9   : > { %p2288_p7 = scmp.ne.s32.totalorder %s2829_s11, %s2287_s30  ;;  %s2292_s21 = sshll.u32 %s2500_s18, 4  ;;  %s2293_s21 = int_to_ptr.vmem [resolvable:$false] %s2292_s21 }
  0xaa   : > { %s2294_s28 = scalar_lea.vmem %s2293_s21, 1536  ;;  %p2295_p10 = scmp.lt.s32.totalorder %s2829_s11, %s2293_s21 }
  0xab   : > { %p2290_p11 = pnand %p2288_p7, %p2274_p1  ;;  %p2296_p13 = scmp.lt.s32.totalorder %s2294_s28, %s2287_s30 }
  0xad   : > { %p2291_p0 = pneg %p2290_p11  ;;  %p2297_p12 = por %p2296_p13, %p2295_p10 }
  0xaf   : > { %p2298_p9 = pnand %p2297_p12, %p2291_p0 }
  0xb1   : > { %2301 = shalt.err (!%p2298_p9)
}
  0xb2   : > { %2047 = dma.hbm_to_vmem [thread:$0]  (!%p2825_p5), %s2821_s29, 768, %s2829_s11, %s2831_s13, %s3381_s15, %s3381_s15, %s3380_s12  }
  0xb3   : > { %p3386_p1 = scmp.ne.s32.totalorder %s3366_s14, 0 }
  0xb4   : > { %s2864_s27 = sand.u32 (!%p3386_p1), 1, %s2469_s25   ;;  %p3387_p2 = scmp.ne.s32.totalorder (!%p3386_p1), %s3358_s9, 0 }
  0xb5   : > { %288 = sbr.rel (%p3386_p1) target bundleno = 587 (0x24b), region = 36  ;;  %s291_s17 = scalar_lea.sflag (!%p3386_p1), [#allocation3], %s2864_s27 }
  0xb6   : > { %s2016_s0 = smul.u32 (!%p3386_p1), 48, %s2864_s27 }
  0xb8   : > { %s2868_s16 = scalar_lea.vmem (!%p3386_p1), [#allocation2], %s2016_s0 }
  0xbc   : > { %2416 = dma.done.wait (%p3387_p2), %s291_s17, 768  }
  0xbd   : > { %2418 = vsyncadd (%p3387_p2), %s291_s17, 4294966528  ;;  %s299_s29 = sand.u32 1, %s2605_s7   ;;  %s301_s14 = sand.u32 1, %s2457_s22  }
  0xbe   : > { %s2017_s12 = smul.u32 48, %s301_s14  ;;  %s300_s15 = scalar_lea.sflag [#allocation6], %s299_s29 }
  0xbf   : > { %p3388_p5 = scmp.ne.s32.totalorder %s3359_s10, 0 }
  0xc0   : > { %s2876_s4 = scalar_lea.vmem [#allocation5], %s2017_s12 }
  0xc1   : > { %2420 = dma.done.wait (%p3388_p5), %s300_s15, 768  }
  0xc2   : > { %2422 = vsyncadd (%p3388_p5), %s300_s15, 4294966528  ;;  %p3389_p4 = scmp.eq.s32.totalorder %s2605_s7, 0 }
  0xc4   : > { %2424 = dma.done.wait (%p3389_p4), [#allocation6], 576   ;;  %p3390_p8 = pmov %p3389_p4 }
  0xc5   : > { %p3391_p6 = pmov %p3389_p4 }
  0xc6   : > { %2426 = vsyncadd (%p3390_p8), [#allocation6], 4294966720 }
  0xc7   : > { %2428 = dma.done.wait (%p3391_p6), [#allocation9], 16   ;;  %p3392_p3 = pmov %p3389_p4 }
  0xc8   : > { %s345_s9 = sand.u32 1, %s2445_s19   ;;  %vm498_vm0 = vcmask 1043456   ;;  %vm372_vm1 = vsmask.f32 3328  ;;  %vm373_vm2 = vsmask.f32 7440 }
  0xc9   : > { %2430 = vsyncadd (%p3392_p3), [#allocation9], 4294967280  ;;  %s2893_s10 = sshll.u32 %s345_s9, 1  ;;  %v472_v0 = vld [vmem:[#allocation7 + $0x4] sm:$0xf]  ;;  %vm485_vm4 = vcmask 64512  }
  0xca   : > { %v2895_v1 = vld [vmem:[#allocation7 + $0x10] sm:$0xf]  ;;  %2002 = vmatprep.subr.msk.bf16.mxu1 %vm498_vm0, %v472_v0  ;;  %v500_v3 = vsel %vm498_vm0, %v472_v0, 0  ;;  %v2909_v5 = vld [vmem:[%s2868_s16 + $0x4] sm:$0xf]  ;;  %vm2944_vm3 = vmor %vm372_vm1, %vm373_vm2  ;;  %vm671_vm5 = vcmask 1042432  }
  0xcb   : > { %v2898_v2 = vld [vmem:[%s2868_s16] sm:$0xf]  ;;  %2006 = vmatprep.subr.msk.bf16.mxu0 %vm498_vm0, %v2895_v1  ;;  %v2906_v4 = vsel %vm498_vm0, %v2895_v1, 0  ;;  %v2912_v6 = vld [vmem:[%s2868_s16 + $0x8] sm:$0x1]  ;;  %1847 = vmatpush3.bf16.msra.mxu1 %v500_v3  ;;  %v385_v9 = vshll.u32 %v2909_v5, 16 }
  0xcc   : > { %1887 = vmatpush3.bf16.msra.mxu0 %v2906_v4  ;;  %v376_v7 = vshrl.u32 %v2898_v2, 16  ;;  %v379_v8 = vshll.u32 %v2898_v2, 16  ;;  %v389_v10 = vshrl.u32 %v2909_v5, 16  ;;  %v371_v11 = vld [vmem:[#allocation7] sm:$0xf]  ;;  %v395_v12 = vshll.u32 %v2912_v6, 16 }
  0xcd   : > { %2003 = vmatprep.subr.msk.bf16.mxu1 %vm498_vm0, %v371_v11  ;;  %v2922_v13 = vld [vmem:[%s2868_s16 + $0xc] sm:$0xf]  ;;  %v2925_v14 = vld [vmem:[%s2868_s16 + $0x10] sm:$0xf]  ;;  %v387_v17 = vrot.slane %v385_v9, 5  ;;  %v600_v57 = vsel %vm498_vm0, %v371_v11, 0 }
  0xce   : > { %v378_v15 = vrot.slane %v376_v7, 4  ;;  %v381_v16 = vrot.slane %v379_v8, 5  ;;  %v391_v18 = vrot.slane %v389_v10, 4  ;;  %v2928_v19 = vld [vmem:[%s2868_s16 + $0x14] sm:$0x1]  ;;  %v397_v20 = vrot.slane %v395_v12, 5 }
  0xcf   : > { %v400_v21 = vshrl.u32 %v2922_v13, 16  ;;  %v403_v22 = vshll.u32 %v2922_v13, 16  ;;  %v409_v23 = vshll.u32 %v2925_v14, 16  ;;  %v2933_v24 = vld [vmem:[#allocation7 + $0x14] sm:$0xf]  ;;  %v413_v27 = vshrl.u32 %v2925_v14, 16 }
  0xd0   : > { %v382_v25 = vor.u32 %v381_v16, %v378_v15  ;;  %v392_v26 = vor.u32 %v391_v18, %v387_v17  ;;  %v419_v28 = vshll.u32 %v2928_v19, 16  ;;  %2008 = vmatprep.subr.msk.bf16.mxu0 %vm498_vm0, %v2933_v24  ;;  %v2940_v29 = vld [vmem:[%s2868_s16 + $0x18] sm:$0xf]  ;;  %v2949_v37 = vld [vmem:[%s2868_s16 + $0x1c] sm:$0xf]  ;;  %vm672_vm6 = vcmask 1046532  }
  0xd1   : > { %v402_v31 = vrot.slane %v400_v21, 4  ;;  %v405_v32 = vrot.slane %v403_v22, 5  ;;  %v411_v33 = vrot.slane %v409_v23, 5  ;;  %v415_v36 = vrot.slane %v413_v27, 4  ;;  %v2952_v40 = vld [vmem:[%s2868_s16 + $0x20] sm:$0x1]  ;;  %vm2990_vm7 = vmor %vm671_vm5, %vm672_vm6 }
  0xd2   : > { %v383_v34 = vrot.slane %v382_v25, 4  ;;  %v393_v35 = vrot.slane %v392_v26, 4  ;;  %v421_v39 = vrot.slane %v419_v28, 5  ;;  %v424_v41 = vshrl.u32 %v2940_v29, 16  ;;  %v2962_v50 = vld [vmem:[%s2868_s16 + $0x24] sm:$0xf] }
  0xd3   : > { %v406_v38 = vor.u32 %v405_v32, %v402_v31  ;;  %v416_v44 = vor.u32 %v415_v36, %v411_v33  ;;  %v427_v45 = vshll.u32 %v2940_v29, 16  ;;  %v433_v49 = vshll.u32 %v2949_v37, 16  ;;  %v2967_v55 = vld [vmem:[%s2868_s16 + $0x28] sm:$0xf]  ;;  %v2974_v59 = vld [vmem:[%s2868_s16 + $0x2c] sm:$0x1] }
  0xd4   : > { %v388_v42 = vsel %vm2944_vm3, %v383_v34, %v387_v17  ;;  %v398_v43 = vsel %vm2944_vm3, %v393_v35, %v397_v20  ;;  %v426_v48 = vrot.slane %v424_v41, 4  ;;  %v437_v53 = vshrl.u32 %v2949_v37, 16  ;;  %v703_v15 = vld [vmem:[#allocation7 + $0x8] sm:$0xf]  ;;  %v1091_v41 = vld [vmem:[#allocation7 + $0x18] sm:$0xf] }
  0xd5   : > { %v1713_v46 = vcombine.low %v388_v42, %v398_v43  ;;  %v407_v47 = vrot.slane %v406_v38, 4  ;;  %v417_v51 = vrot.slane %v416_v44, 4  ;;  %v429_v52 = vrot.slane %v427_v45, 5  ;;  %s1711_s7 = sshll.u32 %s2864_s27, 5  ;;  %s3187_s13 = scalar_lea.vmem [#allocation11], %s2893_s10 }
  0xd6   : > { %v443_v54 = vshll.u32 %v2952_v40, 16  ;;  %v435_v58 = vrot.slane %v433_v49, 5  ;;  %v439_v62 = vrot.slane %v437_v53, 4  ;;  %v448_v3 = vshrl.u32 %v2962_v50, 16  ;;  %s3152_s11 = scalar_lea.vmem [#allocation10], %s1711_s7  ;;  %s3397_s5 = sld [smem:[#allocation21_spill]] }
  0xd7   : > { %1848 = vmatprep.mubr.msk.bf16.mxu1 %vm485_vm4, %v1713_v46  ;;  %v412_v56 = vsel %vm2944_vm3, %v407_v47, %v411_v33  ;;  %v422_v60 = vsel %vm2944_vm3, %v417_v51, %v421_v39  ;;  %v430_v61 = vor.u32 %v429_v52, %v426_v48  ;;  %v451_v7 = vshll.u32 %v2962_v50, 16  ;;  %v366_v52 = vld [vmem:[%s2876_s4 + $0x4] sm:$0xf] }
  0xd8   : > { %v445_v63 = vrot.slane %v443_v54, 5  ;;  %v1714_v0 = vcombine.low %v412_v56, %v422_v60  ;;  %v457_v8 = vshll.u32 %v2967_v55, 16  ;;  %v440_v10 = vor.u32 %v439_v62, %v435_v58  ;;  %v3040_v62 = vld [vmem:[%s2876_s4 + $0x8] sm:$0x1] }
  0xd9   : > { %v431_v9 = vrot.slane %v430_v61, 4  ;;  %v461_v11 = vshrl.u32 %v2967_v55, 16  ;;  %v467_v12 = vshll.u32 %v2974_v59, 16  ;;  %v450_v16 = vrot.slane %v448_v3, 4  ;;  %v365_v61 = vld [vmem:[%s2876_s4] sm:$0xf] }
  0xda   : > { %1888 = vmatprep.mubr.msk.bf16.mxu0 %vm485_vm4, %v1714_v0  ;;  %1849 = vmatmul.mubr.msk.bf16.vlgmr.msra.gmra.mrb[0].mxu1 %vm485_vm4, %v1714_v0  ;;  %v453_v17 = vrot.slane %v451_v7, 5  ;;  %v459_v18 = vrot.slane %v457_v8, 5  ;;  %v1730_v20 = vrot.slane %v2922_v13, 9  ;;  %v441_v22 = vrot.slane %v440_v10, 4 }
  0xdb   : > { %1857 = vmatpush3.bf16.msra.mxu1 %v600_v57  ;;  %v436_v21 = vsel %vm2944_vm3, %v431_v9, %v435_v58  ;;  %v463_v23 = vrot.slane %v461_v11, 4  ;;  %v686_v26 = vrot.slane %v2928_v19, 5  ;;  %v1015_v27 = vsel %vm498_vm0, %v2933_v24, 0 }
  0xdc   : > { %v454_v28 = vor.u32 %v453_v17, %v450_v16  ;;  %v683_v31 = vrot.slane %v2925_v14, 5  ;;  %2004 = vmatprep.subr.msk.bf16.mxu1 %vm498_vm0, %v703_v15  ;;  %v446_v32 = vsel %vm2944_vm3, %v441_v22, %v445_v63  ;;  %v469_v34 = vrot.slane %v467_v12, 5  ;;  %p1782_p7 = scmp.ne.s32.totalorder %s3397_s5, 0 }
  0xdd   : > { %v464_v33 = vor.u32 %v463_v23, %v459_v18  ;;  %v690_v35 = vrot.slane %v2949_v37, 5  ;;  %v3002_v36 = vcombine.low %v436_v21, %v446_v32  ;;  %v1721_v42 = vcombine.low %v2898_v2, %v2909_v5 }
  0xde   : > { %v455_v38 = vrot.slane %v454_v28, 4  ;;  %v684_v19 = vsel %vm2990_vm7, %v1730_v20, %v683_v31  ;;  %v685_v39 = vrot.slane %v683_v31, 4  ;;  %v693_v43 = vrot.slane %v2952_v40, 5 }
  0xdf   : > { %v465_v24 = vrot.slane %v464_v33, 4  ;;  %1889 = vmatmul.mubr.msk.bf16.vlgmr.msra.gmra.mrb[0].mxu0 %vm485_vm4, %v3002_v36  ;;  %1852 = vmatprep.mubr.msk.bf16.mxu1 %vm485_vm4, %v3002_v36  ;;  %v697_v46 = vrot.slane %v2967_v55, 5  ;;  %v1731_v48 = vrot.slane %v2940_v29, 9  ;;  %v692_v49 = vrot.slane %v690_v35, 4 }
  0xe0   : > { %v460_v44 = vsel %vm2944_vm3, %v455_v38, %v459_v18  ;;  %v687_v45 = vsel %vm2990_vm7, %v685_v39, %v686_v26  ;;  %1897 = vmatpush3.bf16.msra.mxu0 %v1015_v27  ;;  %v1732_v53 = vrot.slane %v2962_v50, 9  ;;  %v700_v56 = vrot.slane %v2974_v59, 5  ;;  %v368_v38 = vld [vmem:[%s2876_s4 + $0xc] sm:$0xf]  ;;  %v1293_v39 = vld [vmem:[#allocation7 + $0x20] sm:$0xf] }
  0xe1   : > { %v470_v47 = vsel %vm2944_vm3, %v465_v24, %v469_v34  ;;  %v3020_v40 = vcombine.low %v684_v19, %v687_v45  ;;  %2009 = vmatprep.subr.msk.bf16.mxu0 %vm498_vm0, %v1091_v41  ;;  %v699_v54 = vrot.slane %v697_v46, 4  ;;  %v691_v57 = vsel %vm2990_vm7, %v1731_v48, %v690_v35  ;;  %v369_v19 = vld [vmem:[%s2876_s4 + $0x10] sm:$0xf] }
  0xe2   : > { %v3023_v51 = vcombine.low %v460_v44, %v470_v47  ;;  %v694_v58 = vsel %vm2990_vm7, %v692_v49, %v693_v43  ;;  %v1001_v60 = vrot.slane %v366_v52, 5  ;;  %v676_v63 = vrot.slane %v2909_v5, 5 }
  0xe3   : > { %1898 = vmatprep.mubr.msk.bf16.mxu0 %vm485_vm4, %v3020_v40  ;;  %v698_v59 = vsel %vm2990_vm7, %v1732_v53, %v697_v46  ;;  %v701_v0 = vsel %vm2990_vm7, %v699_v54, %v700_v56  ;;  %v679_v3 = vrot.slane %v2912_v6, 5  ;;  %v3050_v7 = vcombine.low %v2922_v13, %v2925_v14  ;;  %v1201_v14 = vld [vmem:[#allocation7 + $0x1c] sm:$0xf]  ;;  %v370_v53 = vld [vmem:[%s2876_s4 + $0x14] sm:$0x1] }
  0xe4   : > { %1853 = vmatmul.mubr.msk.bf16.gmra.mrb[4].mxu1 %vm485_vm4, %v3023_v51  ;;  %v3052_v8 = vcombine.low %v691_v57, %v694_v58  ;;  %v1101_v9 = vsel %vm498_vm0, %v1091_v41, 0  ;;  %v729_v10 = vsel %vm498_vm0, %v703_v15, 0  ;;  %v1751_v11 = vrot.slane %v365_v61, 9  ;;  %v805_v15 = vld [vmem:[#allocation7 + $0xc] sm:$0xf] }
  0xe5   : > { %1858 = vmatprep.mubr.msk.bf16.mxu1 %vm485_vm4, %v1721_v42  ;;  %v1003_v5 = vrot.slane %v1001_v60, 4  ;;  %v1004_v12 = vrot.slane %v3040_v62, 5  ;;  %v3057_v16 = vcombine.low %v698_v59, %v701_v0  ;;  %v3061_v17 = vcombine.low %v2940_v29, %v2949_v37 }
  0xe6   : > { %v1729_v6 = vrot.slane %v2898_v2, 9  ;;  %v678_v13 = vrot.slane %v676_v63, 4  ;;  %v1002_v18 = vsel %vm2990_vm7, %v1751_v11, %v1001_v60  ;;  %v3086_v21 = vcombine.low %v2962_v50, %v2967_v55 }
  0xe7   : > { %v1005_v29 = vsel %vm2990_vm7, %v1003_v5, %v1004_v12  ;;  %v891_v23 = vshrl.u32 %v365_v61, 16  ;;  %v894_v26 = vshll.u32 %v365_v61, 16  ;;  %v900_v27 = vshll.u32 %v366_v52, 16 }
  0xe8   : > { %v677_v2 = vsel %vm2990_vm7, %v1729_v6, %v676_v63  ;;  %v680_v37 = vsel %vm2990_vm7, %v678_v13, %v679_v3  ;;  %v3082_v20 = vcombine.low %v1002_v18, %v1005_v29  ;;  %v904_v28 = vshrl.u32 %v366_v52, 16 }
  0xe9   : > { %v1733_v22 = vcombine.low %v677_v2, %v680_v37  ;;  %v1209_v50 = vsel %vm498_vm0, %v1201_v14, 0  ;;  %v815_v55 = vsel %vm498_vm0, %v805_v15, 0  ;;  %v1741_v31 = vcombine.low %v365_v61, %v366_v52 }
  0xea   : > { %v893_v32 = vrot.slane %v891_v23, 4  ;;  %v896_v33 = vrot.slane %v894_v26, 5  ;;  %v902_v34 = vrot.slane %v900_v27, 5  ;;  %v906_v35 = vrot.slane %v904_v28, 4 }
  0xeb   : > { %1899 = vmatmul.mubr.msk.bf16.vlgmr.msra.gmra.mrb[0].mxu0 %vm485_vm4, %v3052_v8  ;;  %v1177_v24 = vshrl.u32 %v368_v38, 16  ;;  %v1180_v41 = vshll.u32 %v368_v38, 16  ;;  %v1190_v42 = vshrl.u32 %v369_v19, 16  ;;  %v1186_v43 = vshll.u32 %v369_v19, 16 }
  0xec   : > { %1859 = vmatmul.mubr.msk.bf16.vlgmr.msra.gmra.mrb[0].mxu1 %vm485_vm4, %v3050_v7  ;;  %1907 = vmatpush3.bf16.msra.mxu0 %v1101_v9  ;;  %v897_v44 = vor.u32 %v896_v33, %v893_v32  ;;  %v907_v45 = vor.u32 %v906_v35, %v902_v34  ;;  %v910_v46 = vshll.u32 %v3040_v62, 16  ;;  %v1757_v47 = vcombine.low %v368_v38, %v369_v19 }
  0xed   : > { %1867 = vmatpush3.bf16.msra.mxu1 %v729_v10  ;;  %1902 = vmatprep.mubr.msk.bf16.mxu0 %vm485_vm4, %v3057_v16  ;;  %v1182_v48 = vrot.slane %v1180_v41, 5  ;;  %v1188_v49 = vrot.slane %v1186_v43, 5  ;;  %v1192_v52 = vrot.slane %v1190_v42, 4  ;;  %v1196_v60 = vshll.u32 %v370_v53, 16 }
  0xee   : > { %1862 = vmatprep.mubr.msk.bf16.mxu1 %vm485_vm4, %v3061_v17  ;;  %2010 = vmatprep.subr.msk.bf16.mxu0 %vm498_vm0, %v1201_v14  ;;  %v898_v54 = vrot.slane %v897_v44, 4  ;;  %v908_v56 = vrot.slane %v907_v45, 4  ;;  %v912_v57 = vrot.slane %v910_v46, 5  ;;  %v1301_v3 = vsel %vm498_vm0, %v1293_v39, 0 }
  0xef   : > { %2005 = vmatprep.subr.msk.bf16.mxu1 %vm498_vm0, %v805_v15  ;;  %v1193_v58 = vor.u32 %v1192_v52, %v1188_v49  ;;  %v1198_v0 = vrot.slane %v1196_v60, 5  ;;  %v1767_v11 = vrot.slane %v368_v38, 9  ;;  %v1290_v5 = vrot.slane %v370_v53, 5 }
  0xf0   : > { %v903_v61 = vsel %vm2944_vm3, %v898_v54, %v902_v34  ;;  %v913_v62 = vsel %vm2944_vm3, %v908_v56, %v912_v57  ;;  %vm1423_vm8 = vcmask 125952   ;;  %vm1432_vm9 = vcmask 130048  }
  0xf1   : > { %v1194_v59 = vrot.slane %v1193_v58, 4  ;;  %v1746_v9 = vcombine.low %v903_v61, %v913_v62  ;;  %vm1483_vm10 = vcmask 1040384   ;;  %vm1489_vm11 = vcmask (!%p1782_p7), 123904  }
  0xf3   : > { %1903 = vmatmul.mubr.msk.bf16.gmra.mrb[4].mxu0 %vm485_vm4, %v3082_v20 }
  0xf4   : > { %1863 = vmatmul.mubr.msk.bf16.gmra.mrb[4].mxu1 %vm485_vm4, %v3086_v21  ;;  %1908 = vmatprep.mubr.msk.bf16.mxu0 %vm485_vm4, %v3061_v17 }
  0xf5   : > { %1868 = vmatprep.mubr.msk.bf16.mxu1 %vm485_vm4, %v1733_v22 }
  0xfb   : > { %1909 = vmatmul.mubr.msk.bf16.vlgmr.msra.gmra.mrb[0].mxu0 %vm485_vm4, %v3086_v21 }
  0xfc   : > { %1869 = vmatmul.mubr.msk.bf16.vlgmr.msra.gmra.mrb[0].mxu1 %vm485_vm4, %v3020_v40  ;;  %1917 = vmatpush3.bf16.msra.mxu0 %v1209_v50  ;;  %v1179_v40 = vrot.slane %v1177_v24, 4 }
  0xfd   : > { %1877 = vmatpush3.bf16.msra.mxu1 %v815_v55  ;;  %1912 = vmatprep.mubr.msk.bf16.mxu0 %vm485_vm4, %v1741_v31 }
  0xfe   : > { %1872 = vmatprep.mubr.msk.bf16.mxu1 %vm485_vm4, %v3052_v8  ;;  %2011 = vmatprep.subr.msk.bf16.mxu0 %vm498_vm0, %v1293_v39 }
  0xff   : > { %2007 = vmatprep.subr.msk.bf16.mxu1 %vm498_vm0, %v2895_v1  ;;  %v1183_v1 = vor.u32 %v1182_v48, %v1179_v40 }
 0x101   : > { %v1184_v63 = vrot.slane %v1183_v1, 4 }
 0x103   : > { %1913 = vmatmul.mubr.msk.bf16.gmra.mrb[4].mxu0 %vm485_vm4, %v1757_v47 }
 0x104   : > { %1873 = vmatmul.mubr.msk.bf16.gmra.mrb[4].mxu1 %vm485_vm4, %v3057_v16  ;;  %1918 = vmatprep.mubr.msk.bf16.mxu0 %vm485_vm4, %v3002_v36  ;;  %v1189_v36 = vsel %vm2944_vm3, %v1184_v63, %v1188_v49 }
 0x105   : > { %1878 = vmatprep.mubr.msk.bf16.mxu1 %vm485_vm4, %v3050_v7  ;;  %v1199_v7 = vsel %vm2944_vm3, %v1194_v59, %v1198_v0 }
 0x106   : > { %v1762_v10 = vcombine.low %v1189_v36, %v1199_v7 }
 0x10b   : > { %1919 = vmatmul.mubr.msk.bf16.vlgmr.msra.gmra.mrb[0].mxu0 %vm485_vm4, %v3023_v51 }
 0x10c   : > { %1879 = vmatmul.mubr.msk.bf16.vlgmr.msra.gmra.mrb[0].mxu1 %vm485_vm4, %v3061_v17  ;;  %1927 = vmatpush3.bf16.msra.mxu0 %v1301_v3 }
 0x10d   : > { %1937 = vmatpush3.bf16.msra.mxu1 %v2906_v4  ;;  %1922 = vmatprep.mubr.msk.bf16.mxu0 %vm485_vm4, %v1746_v9  ;;  %v1287_v4 = vrot.slane %v369_v19, 5 }
 0x10e   : > { %1882 = vmatprep.mubr.msk.bf16.mxu1 %vm485_vm4, %v3086_v21 }
 0x10f   : > { %v1289_v30 = vrot.slane %v1287_v4, 4  ;;  %v1288_v12 = vsel %vm2990_vm7, %v1767_v11, %v1287_v4 }
 0x113   : > { %1923 = vmatmul.mubr.msk.bf16.gmra.mrb[4].mxu0 %vm485_vm4, %v1762_v10 }
 0x114   : > { %1883 = vmatmul.mubr.msk.bf16.gmra.mrb[4].mxu1 %vm485_vm4, %v1741_v31  ;;  %1928 = vmatprep.mubr.msk.bf16.mxu0 %vm485_vm4, %v3052_v8  ;;  %v1291_v8 = vsel %vm2990_vm7, %v1289_v30, %v1290_v5 }
 0x115   : > { %1892 = vmatprep.mubr.msk.bf16.mxu1 %vm485_vm4, %v3023_v51  ;;  %v1768_v51 = vcombine.low %v1288_v12, %v1291_v8 }
 0x11b   : > { %1929 = vmatmul.mubr.msk.bf16.vlgmr.msra.gmra.mrb[0].mxu0 %vm485_vm4, %v3057_v16  ;;  %v1773_v16 = vld [vmem:[#allocation8] ss:$0 sm:$0xff] }
 0x11c   : > { %1932 = vmatprep.mubr.msk.bf16.mxu0 %vm485_vm4, %v3082_v20 }
 0x120   : > { %1893 = vmatmul.mubr.msk.bf16.vlgmr.msra.gmra.mrb[4].mxu1 %vm485_vm4, %v1746_v9 }
 0x123   : > { %1933 = vmatmul.mubr.msk.bf16.gmra.mrb[4].mxu0 %vm485_vm4, %v1768_v51 }
 0x1df   : > { %v1880_v17 = vpop.f32.mrb[0].mxu1 }
 0x1e0   : > { %v851_v6 = vpop.f32.mrb[1].mxu1 }
 0x1e1   : > { %v1881_v13 = vpop.f32.mrb[2].mxu1 }
 0x1e2   : > { %v854_v14 = vpop.f32.mrb[3].mxu1 }
 0x1ee   : > { %v1930_v15 = vpop.f32.mrb[0].mxu0 }
 0x1ef   : > { %v1938_v18 = vadd.f32 %v1930_v15, %v1880_v17  ;;  %v1337_v29 = vpop.f32.mrb[1].mxu0 }
 0x1f0   : > { %v1939_v2 = vadd.f32 %v1337_v29, %v851_v6  ;;  %v1931_v37 = vpop.f32.mrb[2].mxu0 }
 0x1f1   : > { %v1385_v20 = vadd.f32 %v1938_v18, %v1773_v16  ;;  %v1940_v21 = vadd.f32 %v1931_v37, %v1881_v13  ;;  %v1340_v25 = vpop.f32.mrb[3].mxu0 }
 0x1f2   : > { %v1383_v22 = vadd.f32 %v1939_v2, %v1773_v16  ;;  %v1941_v23 = vadd.f32 %v1340_v25, %v854_v14 }
 0x1f3   : > { %v1894_v26 = vpop.f32.mrb[4].mxu1  ;;  %v1794_v27 = vpack.c.bf16 %v1385_v20, %v1385_v20  ;;  %v1386_v28 = vadd.f32 %v1940_v21, %v1773_v16  ;;  %v1456_v34 = vmul.f32 %v1385_v20, %v1385_v20  ;;  %v1436_v47 = vsel %vm1432_vm9, %v1385_v20, 0.0 }
 0x1f4   : > { %v975_v50 = vpop.f32.mrb[5].mxu1  ;;  %v1792_v55 = vpack.c.bf16 %v1383_v22, %v1383_v22  ;;  %v1454_v31 = vmul.f32 %v1383_v22, %v1383_v22  ;;  %v1384_v32 = vadd.f32 %v1941_v23, %v1773_v16  ;;  %v1433_v19 = vsel %vm1432_vm9, %v1383_v22, 0.0 }
 0x1f5   : > { %v1895_v33 = vpop.f32.mrb[6].mxu1  ;;  %1426 = vst.msk [vmem:[%s3152_s11 + $0x8] sm:$0xf] %vm1423_vm8, %v1794_v27  ;;  %v1795_v35 = vpack.c.bf16 %v1386_v28, %v1386_v28  ;;  %v1457_v43 = vmul.f32 %v1386_v28, %v1386_v28  ;;  %v1465_v58 = vsel %vm1432_vm9, %v1456_v34, 0.0  ;;  %v1438_v62 = vsel %vm1432_vm9, %v1386_v28, 0.0 }
 0x1f6   : > { %v978_v38 = vpop.f32.mrb[7].mxu1  ;;  %1424 = vst.msk [vmem:[%s3152_s11] sm:$0xf] %vm1423_vm8, %v1792_v55  ;;  %v1793_v39 = vpack.c.bf16 %v1384_v32, %v1384_v32  ;;  %v1434_v24 = vsel %vm1432_vm9, %v1384_v32, 0.0  ;;  %v1455_v41 = vmul.f32 %v1384_v32, %v1384_v32  ;;  %v1934_v42 = vpop.f32.mrb[4].mxu0  ;;  %v1462_v40 = vsel %vm1432_vm9, %v1454_v31, 0.0 }
 0x1f7   : > { %1427 = vst.msk [vmem:[%s3152_s11 + $0xc] sm:$0xf] %vm1423_vm8, %v1795_v35  ;;  %v1435_v44 = vadd.f32 %v1434_v24, %v1433_v19  ;;  %v1942_v45 = vadd.f32 %v1934_v42, %v1894_v26  ;;  %v1353_v46 = vpop.f32.mrb[5].mxu0  ;;  %v1467_v63 = vsel %vm1432_vm9, %v1457_v43, 0.0  ;;  %v2501_v24 = vmov (!%p1782_p7), 0.0  }
 0x1f8   : > { %1425 = vst.msk [vmem:[%s3152_s11 + $0x4] sm:$0xf] %vm1423_vm8, %v1793_v39  ;;  %v1463_v48 = vsel %vm1432_vm9, %v1455_v41, 0.0  ;;  %v1943_v49 = vadd.f32 %v1353_v46, %v975_v50  ;;  %v1935_v52 = vpop.f32.mrb[6].mxu0 }
 0x1f9   : > { %v1437_v53 = vadd.f32 %v1436_v47, %v1435_v44  ;;  %v1464_v54 = vadd.f32 %v1463_v48, %v1462_v40  ;;  %v1389_v56 = vadd.f32 %v1942_v45, %v1773_v16  ;;  %v1944_v57 = vadd.f32 %v1935_v52, %v1895_v33  ;;  %v1356_v1 = vpop.f32.mrb[7].mxu0  ;;  %1490 = vst.msk [vmem:[%s3187_s13] sm:$0x3] (!%p1782_p7), %vm1489_vm11, %v2501_v24 }
 0x1fa   : > { %v1387_v60 = vadd.f32 %v1943_v49, %v1773_v16  ;;  %v1945_v61 = vadd.f32 %v1356_v1, %v978_v38 }
 0x1fb   : > { %v1466_v59 = vadd.f32 %v1465_v58, %v1464_v54  ;;  %v1798_v0 = vpack.c.bf16 %v1389_v56, %v1389_v56  ;;  %v1439_v9 = vadd.f32 %v1438_v62, %v1437_v53  ;;  %v1390_v4 = vadd.f32 %v1944_v57, %v1773_v16 }
 0x1fc   : > { %v1796_v3 = vpack.c.bf16 %v1387_v60, %v1387_v60  ;;  %v1440_v36 = vsel %vm1432_vm9, %v1387_v60, 0.0  ;;  %v1458_v7 = vmul.f32 %v1387_v60, %v1387_v60  ;;  %v1388_v11 = vadd.f32 %v1945_v61, %v1773_v16 }
 0x1fd   : > { %1430 = vst.msk [vmem:[%s3152_s11 + $0x18] sm:$0xf] %vm1423_vm8, %v1798_v0  ;;  %v1468_v10 = vadd.f32 %v1467_v63, %v1466_v59  ;;  %v1441_v30 = vadd.f32 %v1440_v36, %v1439_v9  ;;  %v1799_v8 = vpack.c.bf16 %v1390_v4, %v1390_v4  ;;  %v1460_v51 = vmul.f32 %v1389_v56, %v1389_v56 }
 0x1fe   : > { %1428 = vst.msk [vmem:[%s3152_s11 + $0x10] sm:$0xf] %vm1423_vm8, %v1796_v3  ;;  %v1469_v5 = vsel %vm1432_vm9, %v1458_v7, 0.0  ;;  %v1797_v17 = vpack.c.bf16 %v1388_v11, %v1388_v11  ;;  %v1442_v6 = vsel %vm1432_vm9, %v1388_v11, 0.0  ;;  %v1459_v13 = vmul.f32 %v1388_v11, %v1388_v11 }
 0x1ff   : > { %v1470_v12 = vadd.f32 %v1469_v5, %v1468_v10  ;;  %1431 = vst.msk [vmem:[%s3152_s11 + $0x1c] sm:$0xf] %vm1423_vm8, %v1799_v8  ;;  %v1443_v14 = vadd.f32 %v1442_v6, %v1441_v30  ;;  %v1444_v15 = vsel %vm1432_vm9, %v1389_v56, 0.0  ;;  %v1461_v18 = vmul.f32 %v1390_v4, %v1390_v4 }
 0x200   : > { %1429 = vst.msk [vmem:[%s3152_s11 + $0x14] sm:$0xf] %vm1423_vm8, %v1797_v17  ;;  %v1471_v16 = vsel %vm1432_vm9, %v1459_v13, 0.0  ;;  %v1473_v37 = vsel %vm1432_vm9, %v1460_v51, 0.0  ;;  %v1446_v20 = vsel %vm1432_vm9, %v1390_v4, 0.0 }
 0x201   : > { %v1445_v29 = vadd.f32 %v1444_v15, %v1443_v14  ;;  %v1472_v2 = vadd.f32 %v1471_v16, %v1470_v12  ;;  %v1475_v22 = vsel %vm1432_vm9, %v1461_v18, 0.0 }
 0x203   : > { %v1447_v21 = vadd.f32 %v1446_v20, %v1445_v29  ;;  %v1474_v25 = vadd.f32 %v1473_v37, %v1472_v2 }
 0x205   : > { %v1448_v23 = vrot.slane %v1447_v21, 4  ;;  %v1476_v26 = vadd.f32 %v1475_v22, %v1474_v25 }
 0x207   : > { %v1449_v27 = vadd.f32 %v1448_v23, %v1447_v21  ;;  %v1477_v28 = vrot.slane %v1476_v26, 4 }
 0x209   : > { %v1450_v50 = vrot.slane %v1449_v27, 2  ;;  %v1478_v55 = vadd.f32 %v1477_v28, %v1476_v26 }
 0x20b   : > { %v1451_v31 = vadd.f32 %v1450_v50, %v1449_v27  ;;  %v1479_v32 = vrot.slane %v1478_v55, 2 }
 0x20d   : > { %v1452_v33 = vrot.slane %v1451_v31, 1  ;;  %v1480_v34 = vadd.f32 %v1479_v32, %v1478_v55  ;;  %1488 = sbr.rel (%p1782_p7) target bundleno = 532 (0x214), region = 56 }
 0x20f   : > { %v1481_v35 = vrot.slane %v1480_v34, 1  ;;  %v1453_v38 = vadd.f32 %v1452_v33, %v1451_v31 }
 0x211   : > { %v1482_v19 = vadd.f32 %v1481_v35, %v1480_v34 }
 0x213   : > { %v1484_v39 = vsel %vm1483_vm10, %v1453_v38, %v1482_v19 }
 0x214 PF: > { %s3398_s24 = sld [smem:[#allocation21_spill]]  ;;  %s3399_s30 = sld [smem:[#allocation22_spill]]  ;;  %v1491_v41 = vld [vmem:[%s3187_s13] sm:$0x3]  ;;  %vm1493_vm12 = vcmask 123904  }
 0x215   : > { %s3400_s18 = sld [smem:[#allocation30_spill]]  ;;  %v1492_v42 = vadd.f32 %v1491_v41, %v1484_v39  ;;  %s1517_s0 = sshll.u32 %s3152_s11, 4  ;;  %s3197_s0 = int_to_ptr.vmem [resolvable:$true] %s1517_s0 }
 0x216   : > { %s3401_s12 = sld [smem:[#allocation36_spill]]  ;;  %s1496_s4 = scalar_lea.sflag [#allocation4], %s2864_s27 }
 0x217   : > { %1494 = vst.msk [vmem:[%s3187_s13] sm:$0x3] %vm1493_vm12, %v1492_v42  ;;  %s2303_s10 = scalar_lea.vmem %s3197_s0, 512  ;;  %s2502_s7 = smov [#allocation10]  }
 0x218   : > { %p2304_p11 = scmp.ne.s32.totalorder %s3197_s0, %s2303_s10  ;;  %s2307_s11 = sshll.u32 %s2502_s7, 4  ;;  %s2308_s11 = int_to_ptr.vmem [resolvable:$false] %s2307_s11 }
 0x219   : > { %s2309_s5 = scalar_lea.vmem %s2308_s11, 1024  ;;  %p2310_p12 = scmp.lt.s32.totalorder %s3197_s0, %s2308_s11 }
 0x21a   : > { %s1800_s21 = sshll.u32 %s3398_s24, 3  ;;  %s1787_s28 = sshll.u32 %s3399_s30, 5 }
 0x21b   : > { %s1514_s17 = sadd.s32 %s1800_s21, %s1787_s28  ;;  %p3402_p0 = scmp.ne.s32.totalorder %s3400_s18, 0 }
 0x21c   : > { %s1788_s16 = sshll.u32 %s1514_s17, 6  ;;  %p2311_p9 = scmp.lt.s32.totalorder %s2309_s5, %s2303_s10 }
 0x21d   : > { %s3203_s15 = scalar_lea.hbm %s3401_s12, %s1788_s16  ;;  %p2305_p10 = pnand %p2304_p11, %p3402_p0 }
 0x21e   : > { %p2312_p1 = por %p2311_p9, %p2310_p12 }
 0x21f   : > { %p2306_p13 = pneg %p2305_p10 }
 0x221   : > { %p2313_p2 = pnand %p2312_p1, %p2306_p13 }
 0x223   : > { %2316 = shalt.err (!%p2313_p2)
}
 0x224   : > { %s2317_s24 = scalar_lea.hbm %s3203_s15, 512  ;;  %s2321_s16 = scalar_lea.hbm %s3401_s12, 4096 }
 0x225   : > { %p2318_p5 = scmp.ne.s32.totalorder %s3203_s15, %s2317_s24  ;;  %p2322_p6 = scmp.lt.u32.totalorder %s3203_s15, %s3401_s12 }
 0x226   : > { %p2323_p3 = scmp.lt.u32.totalorder %s2321_s16, %s2317_s24  ;;  %p2325_p11 = scmp.lt.u32.totalorder %s2317_s24, %s3203_s15 }
 0x227   : > { %p2319_p4 = pnand %p2318_p5, %p3402_p0 }
 0x228   : > { %p2324_p7 = por %p2323_p3, %p2322_p6 }
 0x229   : > { %p2320_p8 = pneg %p2319_p4 }
 0x22a   : > { %p2326_p10 = por %p2325_p11, %p2324_p7 }
 0x22c   : > { %p2327_p13 = pnand %p2326_p10, %p2320_p8 }
 0x22e   : > { %2330 = shalt.err (!%p2327_p13)
}
 0x22f   : > { %s2503_s10 = smov 64   ;;  %s3403_s7 = sld [smem:[#allocation26_spill]] }
 0x230   : > { %s2504_s11 = smov 4   ;;  %s3404_s24 = sld [smem:[#allocation37_spill]] }
 0x231   : > { %2030 = dma.vmem_to_hbm [thread:$0]  (%p3402_p0), %s3197_s0, 512, %s3203_s15, %s1496_s4, %s2503_s10, %s2503_s10, %s2504_s11  }
 0x232   : > { %s1533_s29 = sshll.u32 %s3187_s13, 4  ;;  %s1501_s14 = scalar_lea.sflag [#allocation12], %s345_s9  ;;  %s1534_s29 = int_to_ptr.vmem [resolvable:$true] %s1533_s29 }
 0x233   : > { %s2331_s1 = scalar_lea.vmem %s1534_s29, 32  ;;  %s2505_s12 = smov [#allocation11]  }
 0x234   : > { %p2332_p12 = scmp.ne.s32.totalorder %s1534_s29, %s2331_s1  ;;  %s2335_s2 = sshll.u32 %s2505_s12, 4  ;;  %s2336_s2 = int_to_ptr.vmem [resolvable:$false] %s2335_s2 }
 0x235   : > { %p3406_p9 = scmp.ne.s32.totalorder %s3403_s7, 0  ;;  %s2337_s27 = scalar_lea.vmem %s2336_s2, 64 }
 0x236   : > { %s3405_s17 = smov %s3404_s24  ;;  %s3234_s16 = scalar_lea.hbm %s3404_s24, %s1787_s28 }
 0x237   : > { %p2333_p1 = pnand %p2332_p12, %p3406_p9  ;;  %p2338_p0 = scmp.lt.s32.totalorder %s1534_s29, %s2336_s2 }
 0x238   : > { %p2339_p5 = scmp.lt.s32.totalorder %s2337_s27, %s2331_s1 }
 0x239   : > { %p2334_p2 = pneg %p2333_p1 }
 0x23a   : > { %p2340_p4 = por %p2339_p5, %p2338_p0 }
 0x23c   : > { %p2341_p8 = pnand %p2340_p4, %p2334_p2 }
 0x23e   : > { %2344 = shalt.err (!%p2341_p8)
}
 0x23f   : > { %s2345_s9 = scalar_lea.hbm %s3234_s16, 32  ;;  %s2349_s18 = scalar_lea.hbm %s3405_s17, 64 }
 0x240   : > { %p2346_p6 = scmp.ne.s32.totalorder %s3234_s16, %s2345_s9  ;;  %p2350_p11 = scmp.lt.u32.totalorder %s3234_s16, %s3405_s17 }
 0x241   : > { %p2351_p10 = scmp.lt.u32.totalorder %s2349_s18, %s2345_s9  ;;  %p2353_p12 = scmp.lt.u32.totalorder %s2345_s9, %s3234_s16 }
 0x242   : > { %p2347_p3 = pnand %p2346_p6, %p3406_p9 }
 0x243   : > { %p2352_p13 = por %p2351_p10, %p2350_p11 }
 0x244   : > { %p2348_p7 = pneg %p2347_p3 }
 0x245   : > { %p2354_p1 = por %p2353_p12, %p2352_p13 }
 0x247   : > { %p2355_p2 = pnand %p2354_p1, %p2348_p7 }
 0x249   : > { %2358 = shalt.err (!%p2355_p2)
}
 0x24a   : > { %2031 = dma.vmem_to_hbm [thread:$0]  (%p3406_p9), %s1534_s29, 32, %s3234_s16, %s1501_s14  }
 0x24b PF: > { %s3407_s1 = sld [smem:[#allocation20_spill]]  ;;  %s3408_s0 = sld [smem:[#allocation25_spill]] }
 0x24c   : > { %p2060_p0 = scmp.ge.s32.totalorder %s2493_s6, 2 }
 0x251   : > { %s1545_s12 = sand.u32 1, %s3407_s1   ;;  %p3409_p5 = scmp.ne.s32.totalorder %s3408_s0, 0 }
 0x252   : > { %s1546_s15 = scalar_lea.sflag [#allocation4], %s1545_s12 }
 0x253   : > { %p2049_p4 = pnand %p2060_p0, %p3409_p5 }
 0x255   : > { %2432 = dma.done.wait (!%p2049_p4), %s1546_s15, 512  }
 0x256   : > { %2434 = vsyncadd (!%p2049_p4), %s1546_s15, 4294966784  ;;  %s3410_s4 = sld [smem:[#allocation19_spill]]  ;;  %s3411_s10 = sld [smem:[#allocation27_spill]] }
 0x25c   : > { %s1554_s11 = sand.u32 1, %s3410_s4   ;;  %p3412_p8 = scmp.ne.s32.totalorder %s3411_s10, 0 }
 0x25d   : > { %s1555_s5 = scalar_lea.sflag [#allocation12], %s1554_s11 }
 0x25e   : > { %p2052_p6 = pnand %p2060_p0, %p3412_p8 }
 0x260   : > { %2436 = dma.done.wait (!%p2052_p6), %s1555_s5, 32  }
 0x261   : > { %2438 = vsyncadd (!%p2052_p6), %s1555_s5, 4294967264  ;;  %s29_s6 = sadd.s32 1, %s2493_s6   ;;  %s3414_s16 = sld [smem:[#allocation31_spill]] }
 0x262   : > { %p3264_p9 = scmp.ge.s32.totalorder %s29_s6, 10   ;;  %s3415_s27 = sld [smem:[#allocation23_spill]] }
 0x263   : > { %s3416_s28 = sld [smem:[#allocation24_spill]]  ;;  %s3417_s29 = sld [smem:[#allocation28_spill]] }
 0x264   : > { %s3418_s30 = sld [smem:[#allocation29_spill]]  ;;  %s3419_s18 = smov %s2445_s19 }
 0x265   : > { %s3420_s19 = smov %s2449_s20  ;;  %s3421_s20 = smov %s2745_s3 }
 0x266   : > { %s3422_s21 = smov %s2457_s22  ;;  %s3423_s22 = smov %s2461_s23 }
 0x267   : > { %s3424_s23 = smov %s2813_s8  ;;  %s3425_s24 = smov %s2469_s25 }
 0x268   : > { %s3426_s25 = smov %s2473_s26  ;;  %s3427_s26 = smov %s3414_s16 }
 0x269   :  { %28 = sbr.rel (!%p3264_p9) target bundleno = 22 (0x16), region = 131 }
 0x270   :  { %1560 = vsyncpa [#allocation3], 1 }
 0x271   :  { %1562 = vsyncpa [#allocation3 + $0x1], 1 }
 0x272   :  { %1563 = vsyncpa [#allocation6], 1 }
 0x273   :  { %1565 = vsyncpa [#allocation6 + $0x1], 1 }
 0x274   :  { %1566 = vsyncpa [#allocation9], 1 }
 0x275   :  { %1567 = vsyncpa [#allocation4], 1 }
 0x276   :  { %1569 = vsyncpa [#allocation4 + $0x1], 1 }
 0x277   :  { %1570 = vsyncpa [#allocation12], 1 }
 0x278   :  { %1572 = vsyncpa [#allocation12 + $0x1], 1 }

</bundles_post_ra>
